<compile_context>
chip_gen: v7x
topology: tpu7x:2x2x1
jax: 0.10.0
libtpu: 0.0.40
codegen_flags: <defaults>
</compile_context>

<pallas_src>
import jax
import jax.numpy as jnp
from jax import lax
from jax.experimental import pallas as pl
from jax.experimental.pallas import tpu as pltpu


def _csa_kernel(flag_ref, keys_ref, val_ref, shift_ref):
    """CSA shift step for one (batch, query-tile) grid point.

    flag_ref:  (1, HW)     f32, 1.0 where the position is inside the hole (resident)
    keys_ref:  (1, C, HW)  bf16, L2-normalized (over C) candidate features (resident)
    val_ref:   (1, C, HW)  f32, raw features (former == latter == input)    (resident)
    shift_ref: (1, C, TQ)  f32, shifted-feature output tile (lane-dense, TQ % 128 == 0)
    """
    tq = shift_ref.shape[2]
    hw = flag_ref.shape[1]
    qi = pl.program_id(1)
    q0 = pl.multiple_of(qi * tq, tq)

    keys = keys_ref[0]                         # (C, HW) bf16
    flag = flag_ref[...]                       # (1, HW) f32

    # Query tile: raw features of this tile's TQ spatial positions.  Sliced from
    # the resident slab (128-aligned lane slice), transposed once (small, TQ*C),
    # and cast to bf16 so the similarity matmul is MXU-native.
    q_ct = val_ref[0, :, pl.ds(q0, tq)]                          # (C, TQ) f32
    q_tc = jnp.transpose(q_ct, (1, 0)).astype(jnp.bfloat16)      # (TQ, C) bf16

    # util.cosine_similarity: cross-correlate raw queries with normalized
    # candidates (MXU, bf16 inputs, f32 accumulation).
    sim = jnp.dot(q_tc, keys, preferred_element_type=jnp.float32)   # (TQ, HW) f32

    # Only non-hole positions are valid candidates (columns of sim).
    sim = jnp.where(flag > 0.5, jnp.float32(-1e30), sim)

    # torch.max(cosine, dim=1): first-index argmax (explicit tie-break).
    idx = jnp.argmax(sim, axis=-1, keepdims=True)                   # (TQ, 1) int32
    onehot = (lax.broadcasted_iota(jnp.int32, (tq, hw), 1) == idx).astype(jnp.float32)

    # Exact paste: shift[c, q] = values[c, idx[q]] via an f32 one-hot matmul
    # (rows of onehot contain a single 1.0, so the copy is bit-exact).
    # TODO(synk): replace with a true VMEM row/lane gather once dynamic gather
    # along the lane axis is reliably exposed; that would halve MXU work at
    # large HW.
    shift_ct = lax.dot_general(val_ref[0], onehot,
                               (((1,), (1,)), ((), ())),
                               preferred_element_type=jnp.float32)  # (C, TQ) f32

    # Only hole query positions receive the shifted feature.
    qflag = flag_ref[:, pl.ds(q0, tq)]                              # (1, TQ)
    shift_ref[0] = shift_ct * qflag


def _pick_query_tile(hw):
    for cand in (512, 256, 128):
        if hw % cand == 0:
            return cand
    return hw  # tiny feature maps: single tile (block == full dim is allowed)


def csa_forward(x_nchw, mask_hw):
    """x_nchw: (B, C, H, W) features.  mask_hw: (H, W) 0/1 hole mask."""
    B, C, H, W = x_nchw.shape
    HW = H * W
    tq = _pick_query_tile(HW)
    assert HW % tq == 0

    # NCHW-native slabs: (B, C, HW) — only reshapes, no transposes.
    feat = x_nchw.reshape(B, C, HW).astype(jnp.float32)
    # Candidate (key) features, L2-normalized over channels; bf16 for the MXU.
    sumsq = jnp.sum(feat * feat, axis=1, keepdims=True)
    keys = (feat * lax.rsqrt(jnp.maximum(sumsq, 1e-16))).astype(jnp.bfloat16)
    flag = mask_hw.reshape(1, HW).astype(jnp.float32)

    shift = pl.pallas_call(
        _csa_kernel,
        out_shape=jax.ShapeDtypeStruct((B, C, HW), jnp.float32),
        grid_spec=pltpu.PrefetchScalarGridSpec(
            num_scalar_prefetch=0,
            grid=(B, HW // tq),
            in_specs=[
                pl.BlockSpec((1, HW), lambda b, q: (0, 0)),         # hole flag (resident)
                pl.BlockSpec((1, C, HW), lambda b, q: (b, 0, 0)),   # normalized keys (resident per batch)
                pl.BlockSpec((1, C, HW), lambda b, q: (b, 0, 0)),   # raw values (resident per batch)
            ],
            out_specs=pl.BlockSpec((1, C, tq), lambda b, q: (b, 0, q)),
        ),
        compiler_params=pltpu.CompilerParams(
            dimension_semantics=("parallel", "parallel"),
            vmem_limit_bytes=32 * 1024 * 1024,
        ),
    )(flag, keys, feat)

    shift_nchw = shift.reshape(B, C, H, W).astype(x_nchw.dtype)
    # CSAFunction returns torch.cat((former_all, latter_all, shift_masked_all), 1).
    return jnp.concatenate([x_nchw, x_nchw, shift_nchw], axis=1)


class CSAModel:
    """Thin JAX mirror of CSA_model (no learned parameters in this module)."""

    def __init__(self, threshold, fixed_mask, shift_sz=1, stride=1, mask_thred=1,
                 triple_weight=1):
        self.threshold = threshold
        self.fixed_mask = fixed_mask
        self.shift_sz = shift_sz
        self.stride = stride
        self.mask_thred = mask_thred
        self.triple_weight = triple_weight
        self.mask = None

    def set_mask(self, mask_hw):
        # shift_sz=1, mask_thred=1 -> flag is exactly the feature-resolution mask.
        self.mask = mask_hw.astype(jnp.float32)
        return self.mask

    def forward(self, x_nchw):
        assert self.mask is not None, "call set_mask first"
        return csa_forward(x_nchw, self.mask)


def _csa_reference(x_nchw, mask_hw):
    """Pure-JAX reference (gather formulation), same bf16 similarity recipe."""
    B, C, H, W = x_nchw.shape
    HW = H * W
    feat = x_nchw.reshape(B, C, HW).astype(jnp.float32)
    flag = mask_hw.reshape(HW).astype(jnp.float32)
    sumsq = jnp.sum(feat * feat, axis=1, keepdims=True)
    keys = (feat * lax.rsqrt(jnp.maximum(sumsq, 1e-16))).astype(jnp.bfloat16)
    q = feat.astype(jnp.bfloat16)
    sim = jnp.einsum("bcq,bck->bqk", q, keys, preferred_element_type=jnp.float32)
    sim = jnp.where(flag[None, None, :] > 0.5, -1e30, sim)
    idx = jnp.argmax(sim, axis=-1)                                   # (B, HW)
    shift = jnp.take_along_axis(feat, idx[:, None, :], axis=2)       # (B, C, HW)
    shift = shift * flag[None, None, :]
    shift = shift.reshape(B, C, H, W).astype(x_nchw.dtype)
    return jnp.concatenate([x_nchw, x_nchw, shift], axis=1)


if __name__ == "__main__":
    key = jax.random.PRNGKey(0)
    B, C, H, W = 2, 128, 16, 16           # lane-dense C, HW = 256 -> 2 query tiles
    x = jax.random.normal(key, (B, C, H, W), dtype=jnp.float32)

    # Deterministic hole mask at feature resolution: central square is the hole.
    mask = jnp.zeros((H, W), dtype=jnp.float32)
    mask = mask.at[4:12, 4:12].set(1.0)

    model = CSAModel(threshold=5 / 16.0, fixed_mask=1, shift_sz=1, stride=1,
                     mask_thred=1, triple_weight=1)
    model.set_mask(mask)

    out = model.forward(x)
    out = jax.block_until_ready(out)
    assert out.shape == (B, 3 * C, H, W), out.shape

    ref = jax.block_until_ready(_csa_reference(x, mask))
    assert jnp.allclose(out, ref, rtol=1e-4, atol=1e-4), "mismatch vs reference"

    print("KERNEL_OK")
</pallas_src>

<mosaic_0001>
module attributes {stable_mosaic.version = 11 : i64} {
  func.func @_csa_kernel(%arg0: i32, %arg1: i32, %arg2: memref<1x256xf32, #tpu.memory_space<vmem>>, %arg3: memref<1x128x256xbf16, #tpu.memory_space<vmem>>, %arg4: memref<1x128x256xf32, #tpu.memory_space<vmem>>, %arg5: memref<1x128x256xf32, #tpu.memory_space<vmem>>) attributes {dimension_semantics = [#tpu.dimension_semantics<parallel>, #tpu.dimension_semantics<parallel>], iteration_bounds = array<i64: 2, 1>, scalar_prefetch = 0 : i64, scratch_operands = 0 : i64, tpu.core_type = #tpu.core_type<tc>, window_params = [{pipeline_mode = #tpu.pipeline_mode<synchronous>, transform_indices = @transform_0, window_bounds = array<i64: 1, 256>}, {transform_indices = @transform_1, window_bounds = array<i64: 1, 128, 256>}, {transform_indices = @transform_2, window_bounds = array<i64: 1, 128, 256>}, {transform_indices = @transform_3, window_bounds = array<i64: 1, 128, 256>}]} {
    %c256_i32 = arith.constant 256 : i32
    %0 = arith.muli %arg1, %c256_i32 : i32
    %1 = tpu.assume_multiple %0, 256 : i32
    %c0 = arith.constant 0 : index
    %c0_0 = arith.constant 0 : index
    %c0_1 = arith.constant 0 : index
    %2 = vector.load %arg3[%c0, %c0_0, %c0_1] : memref<1x128x256xbf16, #tpu.memory_space<vmem>>, vector<1x128x256xbf16>
    %3 = vector.shape_cast %2 : vector<1x128x256xbf16> to vector<128x256xbf16>
    %c0_2 = arith.constant 0 : index
    %c0_3 = arith.constant 0 : index
    %4 = vector.load %arg2[%c0_2, %c0_3] : memref<1x256xf32, #tpu.memory_space<vmem>>, vector<1x256xf32>
    %c0_4 = arith.constant 0 : index
    %c0_5 = arith.constant 0 : index
    %5 = arith.index_cast %1 : i32 to index
    %6 = vector.load %arg4[%c0_4, %c0_5, %5] : memref<1x128x256xf32, #tpu.memory_space<vmem>>, vector<1x128x256xf32>
    %7 = vector.shape_cast %6 : vector<1x128x256xf32> to vector<128x256xf32>
    %8 = tpu.transpose %7, [1, 0] : vector<128x256xf32> -> vector<256x128xf32>
    %9 = arith.truncf %8 : vector<256x128xf32> to vector<256x128xbf16>
    %cst = arith.constant dense<0.000000e+00> : vector<256x256xf32>
    %10 = tpu.matmul %9, %3, %cst {dimension_numbers = #tpu.dot_dimension_numbers<[1], [0], [0], [1], [0, 0, 1, 1], [], []>} : vector<256x128xbf16>, vector<128x256xbf16>, vector<256x256xf32> -> vector<256x256xf32>
    %cst_6 = arith.constant 5.000000e-01 : f32
    %11 = vector.broadcast %cst_6 : f32 to vector<1x256xf32>
    %12 = arith.cmpf ogt, %4, %11 : vector<1x256xf32>
    %cst_7 = arith.constant -1.000000e+30 : f32
    %13 = vector.shape_cast %12 : vector<1x256xi1> to vector<1x256xi1>
    %14 = vector.broadcast %13 : vector<1x256xi1> to vector<256x256xi1>
    %15 = vector.broadcast %cst_7 : f32 to vector<256x256xf32>
    %16 = arith.select %14, %15, %10 : vector<256x256xi1>, vector<256x256xf32>
    %17 = tpu.reduce_index %16 {axis = 1 : i32, kind = #tpu.reduction_kind<arg_max>} : vector<256x256xf32> -> vector<256xi32>
    %18 = vector.shape_cast %17 : vector<256xi32> to vector<256x1xi32>
    %19 = tpu.iota {dimensions = array<i32: 1>} : vector<256x256xi32>
    %20 = vector.broadcast %18 : vector<256x1xi32> to vector<256x256xi32>
    %21 = arith.cmpi eq, %19, %20 : vector<256x256xi32>
    %22 = arith.extui %21 : vector<256x256xi1> to vector<256x256xi32>
    %23 = arith.sitofp %22 : vector<256x256xi32> to vector<256x256xf32>
    %c0_8 = arith.constant 0 : index
    %c0_9 = arith.constant 0 : index
    %c0_10 = arith.constant 0 : index
    %24 = vector.load %arg4[%c0_8, %c0_9, %c0_10] : memref<1x128x256xf32, #tpu.memory_space<vmem>>, vector<1x128x256xf32>
    %25 = vector.shape_cast %24 : vector<1x128x256xf32> to vector<128x256xf32>
    %cst_11 = arith.constant dense<0.000000e+00> : vector<128x256xf32>
    %26 = tpu.matmul %25, %23, %cst_11 {dimension_numbers = #tpu.dot_dimension_numbers<[1], [1], [0], [0], [0, 0, 1, 0], [], []>} : vector<128x256xf32>, vector<256x256xf32>, vector<128x256xf32> -> vector<128x256xf32>
    %c0_12 = arith.constant 0 : index
    %27 = arith.index_cast %1 : i32 to index
    %28 = vector.load %arg2[%c0_12, %27] : memref<1x256xf32, #tpu.memory_space<vmem>>, vector<1x256xf32>
    %29 = vector.broadcast %28 : vector<1x256xf32> to vector<128x256xf32>
    %30 = arith.mulf %26, %29 : vector<128x256xf32>
    %c0_13 = arith.constant 0 : index
    %c0_14 = arith.constant 0 : index
    %c0_15 = arith.constant 0 : index
    %31 = vector.load %arg5[%c0_13, %c0_14, %c0_15] : memref<1x128x256xf32, #tpu.memory_space<vmem>>, vector<1x128x256xf32>
    %32 = vector.shape_cast %31 : vector<1x128x256xf32> to vector<128x256xf32>
    %33 = vector.shape_cast %30 : vector<128x256xf32> to vector<1x128x256xf32>
    tpu.vector_store %arg5[%c0_13, %c0_14, %c0_15], %33 {strides = array<i32>} : memref<1x128x256xf32, #tpu.memory_space<vmem>>, vector<1x128x256xf32>,
    return
  }
  func.func @transform_0(%arg0: i32, %arg1: i32) -> (i32, i32) {
    %c0_i32 = arith.constant 0 : i32
    %c0_i32_0 = arith.constant 0 : i32
    %c0_i32_1 = arith.constant 0 : i32
    return %c0_i32, %c0_i32_0 : i32, i32
  }
  func.func @transform_1(%arg0: i32, %arg1: i32) -> (i32, i32, i32) {
    %c0_i32 = arith.constant 0 : i32
    %c0_i32_0 = arith.constant 0 : i32
    %c0_i32_1 = arith.constant 0 : i32
    return %arg0, %c0_i32, %c0_i32_0 : i32, i32, i32
  }
  func.func @transform_2(%arg0: i32, %arg1: i32) -> (i32, i32, i32) {
    %c0_i32 = arith.constant 0 : i32
    %c0_i32_0 = arith.constant 0 : i32
    %c0_i32_1 = arith.constant 0 : i32
    return %arg0, %c0_i32, %c0_i32_0 : i32, i32, i32
  }
  func.func @transform_3(%arg0: i32, %arg1: i32) -> (i32, i32, i32) {
    %c0_i32 = arith.constant 0 : i32
    %c0_i32_0 = arith.constant 0 : i32
    return %arg0, %c0_i32, %arg1 : i32, i32, i32
  }
}

</mosaic_0001>

<bundles_post_ra>
// kernel: tpu_custom_call.1
= control target key start
LH: loop header
LB: loop body
LE: loop exit
PB: predicated region body
PF: predicated region fallthrough
CT: control target
= control target key end

     0   :  { %s3570_s0 = inlined_call_operand.hbm [shape: f32[1,256], index: 0, kind: input, shape index: {}]   ;;  %s3571_s1 = inlined_call_operand.hbm [shape: bf16[2,128,256], index: 1, kind: input, shape index: {}]   ;;  %s3572_s2 = inlined_call_operand.hbm [shape: f32[2,128,256], index: 2, kind: input, shape index: {}]   ;;  %s3573_s3 = inlined_call_operand.hbm [shape: f32[2,128,256], index: 3, kind: output, shape index: {}]  }
   0x1   :  { %3612 = sst [smem:[#allocation24_spill]] %s3571_s1 }
   0x2   :  { %3613 = sst [smem:[#allocation25_spill]] %s3572_s2 }
   0x3   :  { %8 = vsyncpa [#allocation3], 0 }
   0x4   :  { %9 = vsyncpa [#allocation6], 0 }
   0x5   :  { %11 = vsyncpa [#allocation6 + $0x1], 0 }
   0x6   :  { %12 = vsyncpa [#allocation4], 0 }
   0x7   :  { %14 = vsyncpa [#allocation4 + $0x1], 0  ;;  %s2320_s12 = smov 0   ;;  %s2322_s13 = smov 0  }
   0x8   :  { %s2324_s14 = smov 0   ;;  %s2326_s15 = smov 0  }
   0x9   :  { %s2328_s16 = smov 0   ;;  %s2330_s17 = smov 0  }
   0xa LB: > { %s32_s18 = sadd.s32 1, %s2282_s16  ;;  %s60_s19 = sadd.s32 1, %s2274_s14  ;;  %s2286_s17 = sphi %s2330_s17, %s20_s17   ;;  %s2282_s16 = sphi %s2328_s16, %s3678_s16   ;;  %s2278_s15 = sphi %s2326_s15, %s3677_s15   ;;  %s2274_s14 = sphi %s2324_s14, %s3676_s14   ;;  %s2270_s13 = sphi %s2322_s13, %s3675_s13   ;;  %s2266_s12 = sphi %s2320_s12, %s3674_s12  }
   0xb   : > { %p34_p0 = scmp.ge.s32.totalorder %s32_s18, 2  ;;  %p67_p1 = scmp.ne.s32.totalorder %s2274_s14, %s2270_s13 }
   0xc   : > { %p68_p2 = scmp.eq.s32.totalorder %s2286_s17, 0  ;;  %p1884_p5 = scmp.lt.s32.totalorder %s2286_s17, 2 }
   0xd   : > { %s3680_s18 = smov (%p34_p0, %s32_s18), 0  ;;  %s162_s21 = sand.u32 1, %s2286_s17  }
   0xe   : > { %p69_p4 = por %p68_p2, %p67_p1  ;;  %s57_s20 = ssub.s32 %s2282_s16, %s3680_s18 }
   0xf   : > { %p58_p6 = scmp.eq.s32.totalorder %s57_s20, 0  ;;  %s164_s22 = sand.u32 1, %s2274_s14  }
  0x10   : > { %s1759_s23 = sshll.u32 %s2282_s16, 11  ;;  %s1599_s25 = sshll.u32 %s164_s22, 7 }
  0x11   : > { %s2368_s24 = scalar_select %p58_p6, %s2274_s14, %s60_s19  }
  0x12   : > { %s3614_s1 = sld [smem:[#allocation24_spill]]  ;;  %p2375_p7 = pnand %p1884_p5, %p69_p4 }
  0x13   : > { %s166_s30 = scalar_lea.vmem [#allocation5], %s1599_s25  ;;  %s2381_s5 = sshll.u32 %s164_s22, 8 }
  0x14   : > { %s173_s4 = sshll.u32 %s166_s30, 4  ;;  %s2383_s6 = scalar_lea.sflag [#allocation6], %s162_s21  ;;  %s2379_s4 = int_to_ptr.vmem [resolvable:$true] %s173_s4 }
  0x15   : > { %p2114_p9 = pneg %p2375_p7 }
  0x18   : > { %s2373_s28 = scalar_lea.hbm %s3614_s1, %s1759_s23  ;;  %s2117_s10 = scalar_lea.hbm %s3614_s1, 4096 }
  0x19   : > { %s2112_s7 = scalar_lea.hbm %s2373_s28, 2048  ;;  %p2118_p12 = scmp.lt.u32.totalorder %s2373_s28, %s3614_s1 }
  0x1a   : > { %p2113_p8 = scmp.ne.s32.totalorder %s2373_s28, %s2112_s7  ;;  %p2119_p13 = scmp.lt.u32.totalorder %s2117_s10, %s2112_s7 }
  0x1b   : > { %p2121_p2 = scmp.lt.u32.totalorder %s2112_s7, %s2373_s28 }
  0x1c   : > { %p2115_p10 = pnand %p2114_p9, %p2113_p8  ;;  %p2120_p0 = por %p2119_p13, %p2118_p12 }
  0x1e   : > { %p2116_p11 = pneg %p2115_p10  ;;  %p2122_p4 = por %p2121_p2, %p2120_p0 }
  0x20   : > { %p2123_p5 = pnand %p2122_p4, %p2116_p11 }
  0x22   : > { %2126 = shalt.err (!%p2123_p5)
}
  0x23   : > { %s2127_s20 = scalar_lea.vmem %s2379_s4, 2048  ;;  %s2288_s21 = smov [#allocation5]  }
  0x24   : > { %p2128_p6 = scmp.ne.s32.totalorder %s2379_s4, %s2127_s20  ;;  %s2132_s22 = sshll.u32 %s2288_s21, 4  ;;  %s2133_s22 = int_to_ptr.vmem [resolvable:$false] %s2132_s22 }
  0x25   : > { %s2134_s23 = scalar_lea.vmem %s2133_s22, 4096  ;;  %p2135_p3 = scmp.lt.s32.totalorder %s2379_s4, %s2133_s22 }
  0x26   : > { %p2130_p8 = pnand %p2128_p6, %p2114_p9  ;;  %p2136_p12 = scmp.lt.s32.totalorder %s2134_s23, %s2127_s20 }
  0x28   : > { %p2131_p10 = pneg %p2130_p8  ;;  %p2137_p13 = por %p2136_p12, %p2135_p3 }
  0x2a   : > { %p2138_p0 = pnand %p2137_p13, %p2131_p10 }
  0x2c   : > { %2141 = shalt.err (!%p2138_p0)
}
  0x2d   : > { %s2289_s25 = smov 128   ;;  %s2290_s26 = smov 8  }
  0x2e   : > { %1875 = dma.hbm_to_vmem [thread:$0]  (!%p2375_p7), %s2373_s28, 2048, %s2379_s4, %s2383_s6, %s2289_s25, %s2289_s25, %s2290_s26  }
  0x2f   : > { %s187_s27 = scalar_lea.vmem [#allocation7], %s2381_s5  ;;  %s2413_s7 = sadd.s32 4294967295, %s2286_s17  }
  0x30   : > { %s194_s30 = sshll.u32 %s187_s27, 4  ;;  %s1595_s8 = sadd.s32 4294967294, %s2286_s17   ;;  %s2451_s30 = int_to_ptr.vmem [resolvable:$true] %s194_s30 }
  0x31   : > { %p73_p3 = scmp.ne.s32.totalorder %s2270_s13, %s2266_s12  ;;  %p3574_p11 = scmp.eq.s32.totalorder %s2413_s7, 0 }
  0x32   : > { %p125_p2 = scmp.eq.s32.totalorder %s2413_s7, 1  ;;  %p131_p4 = scmp.eq.s32.totalorder %s1595_s8, 1 }
  0x33   : > { %p2422_p5 = por %p3574_p11, %p73_p3  ;;  %p1596_p6 = scmp.ge.s32.totalorder %s2286_s17, 1 }
  0x34   : > { %p2430_p8 = por %p125_p2, %p67_p1  ;;  %p2434_p10 = por %p131_p4, %p73_p3 }
  0x35   : > { %s3616_s9 = scalar_select %p2422_p5, 1, 0 }
  0x36   : > { %s3617_s28 = scalar_select %p2430_p8, 1, 0 }
  0x37   : > { %s3618_s4 = scalar_select %p2434_p10, 1, 0 }
  0x38   : > { %p138_p12 = scmp.lt.s32.totalorder %s2286_s17, 3  ;;  %s1760_s5 = sshll.u32 %s2282_s16, 12 }
  0x39   : > { %s2291_s11 = smov [#allocation2]   ;;  %s3620_s2 = sld [smem:[#allocation25_spill]] }
  0x3a   : > { %p2440_p13 = pnand %p1596_p6, %p138_p12  ;;  %s151_s19 = sshll.u32 %s2291_s11, 4  ;;  %s2453_s19 = int_to_ptr.vmem [resolvable:$true] %s151_s19 }
  0x3c   : > { %s3619_s10 = scalar_select %p2440_p13, 1, 0 }
  0x3d   : > { %p1868_p1 = pneg %p2440_p13 }
  0x3f   : > { %s2447_s22 = scalar_lea.hbm %s3620_s2, %s1760_s5  ;;  %p2457_p0 = pnand %p1868_p1, %p3574_p11 }
  0x40   : > { %s2142_s25 = scalar_lea.hbm %s2447_s22, 4096  ;;  %s2147_s8 = scalar_lea.hbm %s3620_s2, 8192 }
  0x41   : > { %p2143_p3 = scmp.ne.s32.totalorder %s2447_s22, %s2142_s25  ;;  %p2148_p6 = scmp.lt.u32.totalorder %s2447_s22, %s3620_s2 }
  0x42   : > { %p2149_p12 = scmp.lt.u32.totalorder %s2147_s8, %s2142_s25  ;;  %p2151_p1 = scmp.lt.u32.totalorder %s2142_s25, %s2447_s22 }
  0x43   : > { %p2145_p2 = pnand %p2143_p3, %p2114_p9 }
  0x44   : > { %p2150_p10 = por %p2149_p12, %p2148_p6 }
  0x45   : > { %p2146_p4 = pneg %p2145_p2 }
  0x46   : > { %p2152_p11 = por %p2151_p1, %p2150_p10 }
  0x48   : > { %p2153_p8 = pnand %p2152_p11, %p2146_p4 }
  0x4a   : > { %2156 = shalt.err (!%p2153_p8)
}
  0x4b   : > { %s2157_s20 = scalar_lea.vmem %s2451_s30, 4096  ;;  %s2292_s21 = smov [#allocation7]  }
  0x4c   : > { %p2158_p3 = scmp.ne.s32.totalorder %s2451_s30, %s2157_s20  ;;  %s2162_s26 = sshll.u32 %s2292_s21, 4  ;;  %s2163_s26 = int_to_ptr.vmem [resolvable:$false] %s2162_s26 }
  0x4d   : > { %s2164_s27 = scalar_lea.vmem %s2163_s26, 8192  ;;  %p2165_p13 = scmp.lt.s32.totalorder %s2451_s30, %s2163_s26 }
  0x4e   : > { %p2160_p2 = pnand %p2158_p3, %p2114_p9  ;;  %p2166_p6 = scmp.lt.s32.totalorder %s2164_s27, %s2157_s20 }
  0x50   : > { %p2161_p5 = pneg %p2160_p2  ;;  %p2167_p12 = por %p2166_p6, %p2165_p13 }
  0x52   : > { %p2168_p10 = pnand %p2167_p12, %p2161_p5 }
  0x54   : > { %2171 = shalt.err (!%p2168_p10)
}
  0x55   : > { %s2293_s25 = smov 256   ;;  %s2294_s8 = smov 16  }
  0x56   : > { %1878 = dma.hbm_to_vmem [thread:$0]  (!%p2375_p7), %s2447_s22, 4096, %s2451_s30, %s2383_s6, %s2293_s25, %s2293_s25, %s2294_s8  }
  0x57   : > { %s2172_s21 = scalar_lea.hbm %s3570_s0, 32  ;;  %p2174_p11 = pneg %p2457_p0 }
  0x58   : > { %p2173_p9 = scmp.ne.s32.totalorder %s3570_s0, %s2172_s21  ;;  %p2179_p13 = scmp.lt.u32.totalorder %s2172_s21, %s3570_s0 }
  0x5a   : > { %p2175_p5 = pnand %p2174_p11, %p2173_p9 }
  0x5c   : > { %p2176_p8 = pneg %p2175_p5 }
  0x5e   : > { %p2181_p4 = pnand %p2179_p13, %p2176_p8 }
  0x60   : > { %2184 = shalt.err (!%p2181_p4)
}
  0x61   : > { %s2185_s29 = scalar_lea.vmem %s2453_s19, 32  ;;  %p2193_p2 = scmp.lt.s32.totalorder %s2453_s19, %s2453_s19 }
  0x62   : > { %p2186_p7 = scmp.ne.s32.totalorder %s2453_s19, %s2185_s29  ;;  %p2194_p6 = scmp.lt.s32.totalorder %s2185_s29, %s2185_s29 }
  0x64   : > { %p2188_p1 = pnand %p2186_p7, %p2174_p11  ;;  %p2195_p12 = por %p2194_p6, %p2193_p2 }
  0x66   : > { %p2189_p3 = pneg %p2188_p1 }
  0x68   : > { %p2196_p10 = pnand %p2195_p12, %p2189_p3 }
  0x6a   : > { %2199 = shalt.err (!%p2196_p10)
}
  0x6b   : > { %1871 = dma.hbm_to_vmem [thread:$0]  (!%p2457_p0), %s3570_s0, 32, %s2453_s19, [#allocation3]  }
  0x6c   : > { %p3622_p9 = scmp.ne.s32.totalorder %s3619_s10, 0 }
  0x6e   : > { %206 = sbr.rel (%p3622_p9) target bundleno = 1327 (0x52f), region = 32 }
  0x75   : > { %p3623_p5 = scmp.eq.s32.totalorder %s2413_s7, 0 }
  0x77   : > { %2253 = dma.done.wait (%p3623_p5), [#allocation3], 32   ;;  %p3624_p11 = pmov %p3623_p5 }
  0x78   : > { %s212_s6 = sand.u32 1, %s2413_s7   ;;  %s2514_s30 = sand.u32 1, %s2270_s13  }
  0x79   : > { %2255 = vsyncadd (%p3624_p11), [#allocation3], 4294967264  ;;  %s1607_s22 = sshll.u32 %s2514_s30, 7  ;;  %s213_s23 = scalar_lea.sflag [#allocation6], %s212_s6 }
  0x7a   : > { %s2517_s27 = scalar_lea.vmem [#allocation5], %s1607_s22  ;;  %p3625_p0 = scmp.ne.s32.totalorder %s3616_s9, 0 }
  0x7c   : > { %2257 = dma.done.wait (%p3625_p0), %s213_s23, 6144  }
  0x7d   : > { %2259 = vsyncadd (%p3625_p0), %s213_s23, 4294961152  ;;  %s1608_s10 = sshll.u32 %s2514_s30, 8  ;;  %v2295_v11 = vmov 0   ;;  %v2088_v15 = vld [vmem:[%s2517_s27 + $0x4] ss:$8 sps:$4 sm:$0xff]   ;;  %s1761_s9 = sshll.u32 %s2278_s15, 12 }
  0x7e   : > { %s2526_s19 = scalar_lea.vmem [#allocation7], %s1608_s10  ;;  %501 = vmatprep.mubr.bf16.mxu0 %v2295_v11  ;;  %v2090_v16 = vld [vmem:[%s2517_s27] ss:$8 sps:$4 sm:$0xff]   ;;  %v2091_v17 = vld [vmem:[%s2517_s27 + $0x14] ss:$8 sps:$4 sm:$0xff]   ;;  %469 = vmatprep.subr.bf16.mxu0 %v2088_v15  ;;  %s3452_s7 = scalar_lea.vmem [#allocation8], %s1608_s10 }
  0x7f   : > { %v277_v0 = vld [vmem:[%s2526_s19] sm:$0xff]  ;;  %v278_v1 = vld [vmem:[%s2526_s19 + $0x8] sm:$0xff]  ;;  %v279_v2 = vld [vmem:[%s2526_s19 + $0x10] sm:$0xff]  ;;  %470 = vmatpush1.bf16.msra.mxu0 %v2090_v16  ;;  %s1475_s25 = sshll.u32 %s3452_s7, 4  ;;  %s3516_s11 = scalar_lea.hbm %s3573_s3, %s1761_s9  ;;  %s3518_s25 = int_to_ptr.vmem [resolvable:$true] %s1475_s25 }
  0x80   : > { %v1944_v3 = vpack.i.bf16 %v278_v1, %v277_v0  ;;  %v280_v4 = vld [vmem:[%s2526_s19 + $0x18] sm:$0xff]  ;;  %v281_v6 = vld [vmem:[%s2526_s19 + $0x20] sm:$0xff]  ;;  %v282_v7 = vld [vmem:[%s2526_s19 + $0x28] sm:$0xff]  ;;  %471 = vmatprep.subr.bf16.mxu0 %v2091_v17  ;;  %s1460_s15 = scalar_lea.sflag [#allocation4], %s2514_s30  ;;  %s2200_s21 = scalar_lea.vmem %s3518_s25, 4096 }
  0x81   : > { %v1946_v5 = vpack.i.bf16 %v280_v4, %v279_v2  ;;  %v1948_v8 = vpack.i.bf16 %v282_v7, %v281_v6  ;;  %v283_v9 = vld [vmem:[%s2526_s19 + $0x30] sm:$0xff]  ;;  %v284_v10 = vld [vmem:[%s2526_s19 + $0x38] sm:$0xff]  ;;  %v285_v12 = vld [vmem:[%s2526_s19 + $0x40] sm:$0xff]  ;;  %p2201_p8 = scmp.ne.s32.totalorder %s3518_s25, %s2200_s21  ;;  %p3671_p13 = scmp.ne.s32.totalorder %s3617_s28, 0 }
  0x82   : > { %1945 = vxpose.xlu0.b32.start [1/16] %v1944_v3, 128  ;;  %v286_v13 = vld [vmem:[%s2526_s19 + $0x48] sm:$0xff]  ;;  %v1950_v14 = vpack.i.bf16 %v284_v10, %v283_v9  ;;  %v2093_v18 = vld [vmem:[%s2517_s27 + $0x10] ss:$8 sps:$4 sm:$0xff]   ;;  %v289_v25 = vld [vmem:[%s2526_s19 + $0x60] sm:$0xff]  ;;  %s2297_s20 = smov [#allocation8]  }
  0x83   : > { %v1952_v19 = vpack.i.bf16 %v286_v13, %v285_v12  ;;  %v287_v20 = vld [vmem:[%s2526_s19 + $0x50] sm:$0xff]  ;;  %v2094_v21 = vld [vmem:[%s2517_s27 + $0x24] ss:$8 sps:$4 sm:$0xff]   ;;  %v288_v22 = vld [vmem:[%s2526_s19 + $0x58] sm:$0xff]  ;;  %472 = vmatpush1.bf16.msra.mxu0 %v2093_v18  ;;  %p2202_p4 = pnand %p2201_p8, %p3671_p13  ;;  %s2204_s26 = sshll.u32 %s2297_s20, 4  ;;  %s2205_s26 = int_to_ptr.vmem [resolvable:$false] %s2204_s26 }
  0x84   : > { %v2096_v23 = vld [vmem:[%s2517_s27 + $0x20] ss:$8 sps:$4 sm:$0xff]   ;;  %v1954_v24 = vpack.i.bf16 %v288_v22, %v287_v20  ;;  %473 = vmatprep.subr.bf16.mxu0 %v2094_v21  ;;  %v2097_v26 = vld [vmem:[%s2517_s27 + $0x34] ss:$8 sps:$4 sm:$0xff]   ;;  %v2099_v28 = vld [vmem:[%s2517_s27 + $0x30] ss:$8 sps:$4 sm:$0xff]   ;;  %p2207_p1 = scmp.lt.s32.totalorder %s3518_s25, %s2205_s26 }
  0x85   : > { %v290_v27 = vld [vmem:[%s2526_s19 + $0x68] sm:$0xff]  ;;  %v291_v31 = vld [vmem:[%s2526_s19 + $0x70] sm:$0xff]  ;;  %v292_v32 = vld [vmem:[%s2526_s19 + $0x78] sm:$0xff]  ;;  %p2203_p7 = pneg %p2202_p4  ;;  %s2206_s29 = scalar_lea.vmem %s2205_s26, 8192 }
  0x86   : > { %1947 = vxpose.xlu0.b32.cont [2/16] %v1946_v5, 128  ;;  %v1956_v29 = vpack.i.bf16 %v290_v27, %v289_v25  ;;  %v2100_v30 = vld [vmem:[%s2517_s27 + $0x44] ss:$8 sps:$4 sm:$0xff]   ;;  %v2102_v33 = vld [vmem:[%s2517_s27 + $0x40] ss:$8 sps:$4 sm:$0xff]   ;;  %v1958_v34 = vpack.i.bf16 %v292_v32, %v291_v31  ;;  %v2103_v35 = vld [vmem:[%s2517_s27 + $0x54] ss:$8 sps:$4 sm:$0xff]   ;;  %p2208_p3 = scmp.lt.s32.totalorder %s2206_s29, %s2200_s21 }
  0x87   : > { %474 = vmatpush1.bf16.msra.mxu0 %v2096_v23  ;;  %v293_v36 = vld [vmem:[%s2526_s19 + $0x80] sm:$0xff]  ;;  %v294_v37 = vld [vmem:[%s2526_s19 + $0x88] sm:$0xff]  ;;  %v2105_v38 = vld [vmem:[%s2517_s27 + $0x50] ss:$8 sps:$4 sm:$0xff]  }
  0x88   : > { %475 = vmatprep.subr.bf16.mxu0 %v2097_v26  ;;  %v1960_v39 = vpack.i.bf16 %v294_v37, %v293_v36  ;;  %v2106_v40 = vld [vmem:[%s2517_s27 + $0x64] ss:$8 sps:$4 sm:$0xff]   ;;  %v295_v41 = vld [vmem:[%s2526_s19 + $0x90] sm:$0xff]  ;;  %v296_v42 = vld [vmem:[%s2526_s19 + $0x98] sm:$0xff]  ;;  %p2209_p2 = por %p2208_p3, %p2207_p1 }
  0x89   : > { %v2108_v43 = vld [vmem:[%s2517_s27 + $0x60] ss:$8 sps:$4 sm:$0xff]   ;;  %v1962_v44 = vpack.i.bf16 %v296_v42, %v295_v41  ;;  %v2109_v45 = vld [vmem:[%s2517_s27 + $0x74] ss:$8 sps:$4 sm:$0xff]   ;;  %v2111_v48 = vld [vmem:[%s2517_s27 + $0x70] ss:$8 sps:$4 sm:$0xff]  }
  0x8a   : > { %1949 = vxpose.xlu0.b32.cont [3/16] %v1948_v8, 128  ;;  %v297_v46 = vld [vmem:[%s2526_s19 + $0xa0] sm:$0xff]  ;;  %v298_v47 = vld [vmem:[%s2526_s19 + $0xa8] sm:$0xff]  ;;  %v299_v50 = vld [vmem:[%s2526_s19 + $0xb0] sm:$0xff]  ;;  %p2210_p6 = pnand %p2209_p2, %p2203_p7 }
  0x8b   : > { %476 = vmatpush1.bf16.msra.mxu0 %v2099_v28  ;;  %v1964_v49 = vpack.i.bf16 %v298_v47, %v297_v46  ;;  %v300_v51 = vld [vmem:[%s2526_s19 + $0xb8] sm:$0xff]  ;;  %v301_v53 = vld [vmem:[%s2526_s19 + $0xc0] sm:$0xff]  ;;  %v302_v54 = vld [vmem:[%s2526_s19 + $0xc8] sm:$0xff] }
  0x8c   : > { %477 = vmatprep.subr.bf16.mxu0 %v2100_v30  ;;  %v1966_v52 = vpack.i.bf16 %v300_v51, %v299_v50  ;;  %v1968_v55 = vpack.i.bf16 %v302_v54, %v301_v53  ;;  %v303_v56 = vld [vmem:[%s2526_s19 + $0xd0] sm:$0xff]  ;;  %v304_v57 = vld [vmem:[%s2526_s19 + $0xd8] sm:$0xff]  ;;  %v305_v59 = vld [vmem:[%s2526_s19 + $0xe0] sm:$0xff] }
  0x8d   : > { %v1970_v58 = vpack.i.bf16 %v304_v57, %v303_v56  ;;  %v306_v60 = vld [vmem:[%s2526_s19 + $0xe8] sm:$0xff]  ;;  %v307_v62 = vld [vmem:[%s2526_s19 + $0xf0] sm:$0xff]  ;;  %v308_v63 = vld [vmem:[%s2526_s19 + $0xf8] sm:$0xff] }
  0x8e   : > { %1951 = vxpose.xlu0.b32.cont [4/16] %v1950_v14, 128  ;;  %v1972_v61 = vpack.i.bf16 %v306_v60, %v305_v59  ;;  %v1974_v0 = vpack.i.bf16 %v308_v63, %v307_v62 }
  0x8f   : > { %478 = vmatpush1.bf16.msra.mxu0 %v2102_v33 }
  0x90   : > { %479 = vmatprep.subr.bf16.mxu0 %v2103_v35 }
  0x92   : > { %1953 = vxpose.xlu0.b32.cont [5/16] %v1952_v19, 128 }
  0x93   : > { %480 = vmatpush1.bf16.msra.mxu0 %v2105_v38 }
  0x94   : > { %481 = vmatprep.subr.bf16.mxu0 %v2106_v40 }
  0x96   : > { %1955 = vxpose.xlu0.b32.cont [6/16] %v1954_v24, 128 }
  0x97   : > { %482 = vmatpush1.bf16.msra.mxu0 %v2108_v43 }
  0x98   : > { %483 = vmatprep.subr.bf16.mxu0 %v2109_v45 }
  0x9a   : > { %1957 = vxpose.xlu0.b32.cont [7/16] %v1956_v29, 128 }
  0x9b   : > { %484 = vmatpush1.bf16.msra.mxu0 %v2111_v48 }
  0x9e   : > { %1959 = vxpose.xlu0.b32.cont [8/16] %v1958_v34, 128 }
  0xa2   : > { %1961 = vxpose.xlu0.b32.cont [9/16] %v1960_v39, 128 }
  0xa6   : > { %1963 = vxpose.xlu0.b32.cont [10/16] %v1962_v44, 128 }
  0xaa   : > { %1965 = vxpose.xlu0.b32.cont [11/16] %v1964_v49, 128 }
  0xae   : > { %1967 = vxpose.xlu0.b32.cont [12/16] %v1966_v52, 128 }
  0xb2   : > { %1969 = vxpose.xlu0.b32.cont [13/16] %v1968_v55, 128 }
  0xb6   : > { %1971 = vxpose.xlu0.b32.cont [14/16] %v1970_v58, 128 }
  0xba   : > { %1973 = vxpose.xlu0.b32.cont [15/16] %v1972_v61, 128 }
  0xbe   : > { %1975 = vxpose.xlu0.b32.end [16/16] %v1974_v0, 128 }
 0x102   : > { %v1976_v1 = vpop.trf.xlu0 }
 0x103   : > { %v1980_v2 = vunpack.i.h.bf16 %v1976_v1  ;;  %v1977_v3 = vunpack.i.l.bf16 %v1976_v1 }
 0x106   : > { %v1981_v4 = vpop.trf.xlu0 }
 0x107   : > { %v1985_v5 = vunpack.i.h.bf16 %v1981_v4  ;;  %v1982_v6 = vunpack.i.l.bf16 %v1981_v4 }
 0x109   : > { %v373_v7 = vpack.c.bf16 %v1982_v6, %v1977_v3  ;;  %v2577_v8 = vpack.c.bf16 %v1985_v5, %v1980_v2  ;;  %v3593_v2 = vlaneseq  ;;  %v272_v3 = vld [vmem:[#allocation2] sm:$0x3] }
 0x10a   : > { %v1986_v9 = vpop.trf.xlu0  ;;  %vm662_vm0 = vcmp.gt.f32.partialorder %v272_v3, 0.5 }
 0x10b   : > { %502 = vmatmul.mubr.bf16.vlgmr.msra.gmra.mrb[0].mxu0 %v373_v7  ;;  %v1990_v10 = vunpack.i.h.bf16 %v1986_v9  ;;  %v1987_v12 = vunpack.i.l.bf16 %v1986_v9  ;;  %v2596_v4 = vshrl.u32 %v3593_v2, 7  ;;  %v663_v6 = vsel %vm662_vm0, 1, %v2295_v11 }
 0x10c   : > { %511 = vmatprep.mubr.bf16.mxu0 %v2295_v11 }
 0x10d   : > { %3626 = vst [vmem:[#allocation12_spill] sm:$0xff] %v2596_v4  ;;  %v3592_v5 = vsub.s32 0, %v2596_v4  ;;  %v3590_v7 = vsub.s32 1, %v2596_v4 }
 0x10e   : > { %v1991_v13 = vpop.trf.xlu0 }
 0x10f   : > { %v1995_v14 = vunpack.i.h.bf16 %v1991_v13  ;;  %v1992_v15 = vunpack.i.l.bf16 %v1991_v13  ;;  %v2607_v9 = vrot.slane %v663_v6, %v3590_v7 }
 0x111   : > { %v374_v16 = vpack.c.bf16 %v1992_v15, %v1987_v12  ;;  %v382_v17 = vpack.c.bf16 %v1995_v14, %v1990_v10  ;;  %vm673_vm2 = vcmp.eq.s32.totalorder %v2607_v9, 1  ;;  %v3638_v9 = vlaneseq }
 0x112   : > { %v1996_v18 = vpop.trf.xlu0 }
 0x113   : > { %512 = vmatmul.mubr.bf16.gmra.mrb[4].mxu0 %v374_v16  ;;  %v2000_v19 = vunpack.i.h.bf16 %v1996_v18  ;;  %v1997_v20 = vunpack.i.l.bf16 %v1996_v18 }
 0x114   : > { %521 = vmatprep.mubr.bf16.mxu0 %v2295_v11 }
 0x116   : > { %v2001_v21 = vpop.trf.xlu0 }
 0x117   : > { %v2005_v22 = vunpack.i.h.bf16 %v2001_v21  ;;  %v2002_v23 = vunpack.i.l.bf16 %v2001_v21 }
 0x119   : > { %v375_v24 = vpack.c.bf16 %v2002_v23, %v1997_v20  ;;  %v383_v25 = vpack.c.bf16 %v2005_v22, %v2000_v19 }
 0x11a   : > { %v2006_v26 = vpop.trf.xlu0 }
 0x11b   : > { %522 = vmatmul.mubr.bf16.gmra.mrb[8].mxu0 %v375_v24  ;;  %v2010_v27 = vunpack.i.h.bf16 %v2006_v26  ;;  %v2007_v28 = vunpack.i.l.bf16 %v2006_v26 }
 0x11c   : > { %531 = vmatprep.mubr.bf16.mxu0 %v2295_v11 }
 0x11e   : > { %v2011_v29 = vpop.trf.xlu0 }
 0x11f   : > { %v2015_v30 = vunpack.i.h.bf16 %v2011_v29  ;;  %v2012_v31 = vunpack.i.l.bf16 %v2011_v29 }
 0x121   : > { %v376_v32 = vpack.c.bf16 %v2012_v31, %v2007_v28  ;;  %v384_v33 = vpack.c.bf16 %v2015_v30, %v2010_v27 }
 0x122   : > { %v2016_v34 = vpop.trf.xlu0 }
 0x123   : > { %532 = vmatmul.mubr.bf16.gmra.mrb[12].mxu0 %v376_v32  ;;  %v2020_v35 = vunpack.i.h.bf16 %v2016_v34  ;;  %v2017_v36 = vunpack.i.l.bf16 %v2016_v34 }
 0x124   : > { %541 = vmatprep.mubr.bf16.mxu0 %v2295_v11 }
 0x126   : > { %v2021_v37 = vpop.trf.xlu0 }
 0x127   : > { %v2025_v38 = vunpack.i.h.bf16 %v2021_v37  ;;  %v2022_v39 = vunpack.i.l.bf16 %v2021_v37 }
 0x129   : > { %v377_v40 = vpack.c.bf16 %v2022_v39, %v2017_v36  ;;  %v385_v41 = vpack.c.bf16 %v2025_v38, %v2020_v35 }
 0x12a   : > { %v2026_v42 = vpop.trf.xlu0 }
 0x12b   : > { %542 = vmatmul.mubr.bf16.gmra.mrb[16].mxu0 %v377_v40  ;;  %v2030_v43 = vunpack.i.h.bf16 %v2026_v42  ;;  %v2027_v44 = vunpack.i.l.bf16 %v2026_v42 }
 0x12c   : > { %551 = vmatprep.mubr.bf16.mxu0 %v2295_v11 }
 0x12e   : > { %v2031_v45 = vpop.trf.xlu0 }
 0x12f   : > { %v2035_v46 = vunpack.i.h.bf16 %v2031_v45  ;;  %v2032_v47 = vunpack.i.l.bf16 %v2031_v45 }
 0x131   : > { %v378_v48 = vpack.c.bf16 %v2032_v47, %v2027_v44  ;;  %v386_v49 = vpack.c.bf16 %v2035_v46, %v2030_v43 }
 0x132   : > { %v2036_v50 = vpop.trf.xlu0 }
 0x133   : > { %552 = vmatmul.mubr.bf16.gmra.mrb[20].mxu0 %v378_v48  ;;  %v2040_v51 = vunpack.i.h.bf16 %v2036_v50  ;;  %v2037_v52 = vunpack.i.l.bf16 %v2036_v50 }
 0x134   : > { %561 = vmatprep.mubr.bf16.mxu0 %v2295_v11 }
 0x136   : > { %v2041_v53 = vpop.trf.xlu0 }
 0x137   : > { %v2045_v54 = vunpack.i.h.bf16 %v2041_v53  ;;  %v2042_v55 = vunpack.i.l.bf16 %v2041_v53 }
 0x139   : > { %v379_v56 = vpack.c.bf16 %v2042_v55, %v2037_v52  ;;  %v387_v57 = vpack.c.bf16 %v2045_v54, %v2040_v51 }
 0x13a   : > { %v2046_v58 = vpop.trf.xlu0 }
 0x13b   : > { %562 = vmatmul.mubr.bf16.gmra.mrb[24].mxu0 %v379_v56  ;;  %v2047_v59 = vunpack.i.l.bf16 %v2046_v58  ;;  %v2050_v63 = vunpack.i.h.bf16 %v2046_v58 }
 0x13c   : > { %571 = vmatprep.mubr.bf16.mxu0 %v2295_v11 }
 0x13e   : > { %v2051_v60 = vpop.trf.xlu0 }
 0x13f   : > { %v2052_v61 = vunpack.i.l.bf16 %v2051_v60  ;;  %v2055_v0 = vunpack.i.h.bf16 %v2051_v60 }
 0x141   : > { %v380_v62 = vpack.c.bf16 %v2052_v61, %v2047_v59  ;;  %v388_v1 = vpack.c.bf16 %v2055_v0, %v2050_v63 }
 0x143   : > { %572 = vmatmul.mubr.bf16.gmra.mrb[28].mxu0 %v380_v62 }
 0x144   : > { %581 = vmatprep.mubr.bf16.mxu0 %v2295_v11 }
 0x14b   : > { %582 = vmatmul.mubr.bf16.gmra.mrb[32].mxu0 %v2577_v8  ;;  %v2603_v8 = vrot.slane %v663_v6, %v3592_v5 }
 0x14c   : > { %591 = vmatprep.mubr.bf16.mxu0 %v2295_v11 }
 0x14d   : > { %vm672_vm1 = vcmp.eq.s32.totalorder %v2603_v8, 1 }
 0x153   : > { %592 = vmatmul.mubr.bf16.gmra.mrb[36].mxu0 %v382_v17 }
 0x154   : > { %601 = vmatprep.mubr.bf16.mxu0 %v2295_v11 }
 0x15b   : > { %602 = vmatmul.mubr.bf16.gmra.mrb[40].mxu0 %v383_v25 }
 0x15c   : > { %611 = vmatprep.mubr.bf16.mxu0 %v2295_v11 }
 0x163   : > { %612 = vmatmul.mubr.bf16.gmra.mrb[44].mxu0 %v384_v33 }
 0x164   : > { %621 = vmatprep.mubr.bf16.mxu0 %v2295_v11 }
 0x16b   : > { %622 = vmatmul.mubr.bf16.gmra.mrb[48].mxu0 %v385_v41 }
 0x16c   : > { %631 = vmatprep.mubr.bf16.mxu0 %v2295_v11 }
 0x173   : > { %632 = vmatmul.mubr.bf16.gmra.mrb[52].mxu0 %v386_v49 }
 0x174   : > { %641 = vmatprep.mubr.bf16.mxu0 %v2295_v11 }
 0x17b   : > { %642 = vmatmul.mubr.bf16.gmra.mrb[56].mxu0 %v387_v57 }
 0x17c   : > { %651 = vmatprep.mubr.bf16.mxu0 %v2295_v11 }
 0x183   : > { %652 = vmatmul.mubr.bf16.gmra.mrb[60].mxu0 %v388_v1 }
 0x1de   : > { %v503_v10 = vpop.f32.mrb[0].mxu0 }
 0x1df   : > { %v2613_v12 = vsel %vm672_vm1, -1e+30, %v503_v10  ;;  %v505_v11 = vpop.f32.mrb[1].mxu0 }
 0x1e0   : > { %v2617_v13 = vsel %vm673_vm2, -1e+30, %v505_v11  ;;  %v507_v14 = vpop.f32.mrb[2].mxu0 }
 0x1e1   : > { %vm741_vm3 = vcmp.ge.f32.partialorder %v2613_v12, %v2617_v13  ;;  %v2623_v15 = vsel %vm672_vm1, -1e+30, %v507_v14  ;;  %v509_v16 = vpop.f32.mrb[3].mxu0 }
 0x1e2   : > { %v2627_v17 = vsel %vm673_vm2, -1e+30, %v509_v16  ;;  %v742_v18 = vsel %vm741_vm3, %v2613_v12, %v2617_v13 }
 0x1e3   : > { %vm749_vm4 = vcmp.ge.f32.partialorder %v2623_v15, %v2627_v17  ;;  %744 = vmax.index.xlane.f32.xlu1 %v742_v18 }
 0x1e4   : > { %v750_v19 = vsel %vm749_vm4, %v2623_v15, %v2627_v17 }
 0x1e6   : > { %v513_v20 = vpop.f32.mrb[4].mxu0 }
 0x1e7   : > { %v2643_v21 = vsel %vm672_vm1, -1e+30, %v513_v20  ;;  %752 = vmax.index.xlane.f32.xlu1 %v750_v19  ;;  %v515_v22 = vpop.f32.mrb[5].mxu0 }
 0x1e8   : > { %v2647_v23 = vsel %vm673_vm2, -1e+30, %v515_v22  ;;  %v517_v24 = vpop.f32.mrb[6].mxu0 }
 0x1e9   : > { %vm757_vm5 = vcmp.ge.f32.partialorder %v2643_v21, %v2647_v23  ;;  %v2653_v25 = vsel %vm672_vm1, -1e+30, %v517_v24  ;;  %v519_v26 = vpop.f32.mrb[7].mxu0 }
 0x1ea   : > { %v2657_v27 = vsel %vm673_vm2, -1e+30, %v519_v26  ;;  %v758_v28 = vsel %vm757_vm5, %v2643_v21, %v2647_v23 }
 0x1eb   : > { %vm765_vm6 = vcmp.ge.f32.partialorder %v2653_v25, %v2657_v27  ;;  %760 = vmax.index.xlane.f32.xlu0 %v758_v28 }
 0x1ec   : > { %v766_v29 = vsel %vm765_vm6, %v2653_v25, %v2657_v27 }
 0x1ed   : > { %768 = vmax.index.xlane.f32.xlu1 %v766_v29 }
 0x1ee   : > { %v523_v30 = vpop.f32.mrb[8].mxu0 }
 0x1ef   : > { %v2673_v31 = vsel %vm672_vm1, -1e+30, %v523_v30  ;;  %v525_v32 = vpop.f32.mrb[9].mxu0 }
 0x1f0   : > { %v2677_v33 = vsel %vm673_vm2, -1e+30, %v525_v32  ;;  %v527_v34 = vpop.f32.mrb[10].mxu0 }
 0x1f1   : > { %vm773_vm7 = vcmp.ge.f32.partialorder %v2673_v31, %v2677_v33  ;;  %v2683_v35 = vsel %vm672_vm1, -1e+30, %v527_v34  ;;  %v529_v36 = vpop.f32.mrb[11].mxu0 }
 0x1f2   : > { %v2687_v37 = vsel %vm673_vm2, -1e+30, %v529_v36  ;;  %v774_v38 = vsel %vm773_vm7, %v2673_v31, %v2677_v33 }
 0x1f3   : > { %vm781_vm8 = vcmp.ge.f32.partialorder %v2683_v35, %v2687_v37  ;;  %776 = vmax.index.xlane.f32.xlu1 %v774_v38 }
 0x1f4   : > { %v782_v39 = vsel %vm781_vm8, %v2683_v35, %v2687_v37 }
 0x1f6   : > { %v533_v40 = vpop.f32.mrb[12].mxu0 }
 0x1f7   : > { %v2703_v41 = vsel %vm672_vm1, -1e+30, %v533_v40  ;;  %784 = vmax.index.xlane.f32.xlu1 %v782_v39  ;;  %v535_v42 = vpop.f32.mrb[13].mxu0 }
 0x1f8   : > { %v2707_v43 = vsel %vm673_vm2, -1e+30, %v535_v42  ;;  %v537_v44 = vpop.f32.mrb[14].mxu0 }
 0x1f9   : > { %vm789_vm9 = vcmp.ge.f32.partialorder %v2703_v41, %v2707_v43  ;;  %v2713_v45 = vsel %vm672_vm1, -1e+30, %v537_v44  ;;  %v539_v46 = vpop.f32.mrb[15].mxu0 }
 0x1fa   : > { %v2717_v47 = vsel %vm673_vm2, -1e+30, %v539_v46  ;;  %v790_v48 = vsel %vm789_vm9, %v2703_v41, %v2707_v43 }
 0x1fb   : > { %vm797_vm10 = vcmp.ge.f32.partialorder %v2713_v45, %v2717_v47  ;;  %792 = vmax.index.xlane.f32.xlu0 %v790_v48 }
 0x1fc   : > { %v798_v49 = vsel %vm797_vm10, %v2713_v45, %v2717_v47 }
 0x1fd   : > { %800 = vmax.index.xlane.f32.xlu1 %v798_v49 }
 0x1fe   : > { %v543_v50 = vpop.f32.mrb[16].mxu0 }
 0x1ff   : > { %v2733_v51 = vsel %vm672_vm1, -1e+30, %v543_v50  ;;  %v545_v52 = vpop.f32.mrb[17].mxu0 }
 0x200   : > { %v2737_v53 = vsel %vm673_vm2, -1e+30, %v545_v52  ;;  %v547_v54 = vpop.f32.mrb[18].mxu0 }
 0x201   : > { %vm805_vm11 = vcmp.ge.f32.partialorder %v2733_v51, %v2737_v53  ;;  %v2743_v55 = vsel %vm672_vm1, -1e+30, %v547_v54  ;;  %v549_v56 = vpop.f32.mrb[19].mxu0 }
 0x202   : > { %v2747_v57 = vsel %vm673_vm2, -1e+30, %v549_v56  ;;  %v806_v58 = vsel %vm805_vm11, %v2733_v51, %v2737_v53 }
 0x203   : > { %vm813_vm12 = vcmp.ge.f32.partialorder %v2743_v55, %v2747_v57  ;;  %808 = vmax.index.xlane.f32.xlu1 %v806_v58 }
 0x204   : > { %v814_v59 = vsel %vm813_vm12, %v2743_v55, %v2747_v57 }
 0x205   : > { %816 = vmax.index.xlane.f32.xlu0 %v814_v59 }
 0x206   : > { %v553_v60 = vpop.f32.mrb[20].mxu0 }
 0x207   : > { %v2763_v61 = vsel %vm672_vm1, -1e+30, %v553_v60  ;;  %v555_v62 = vpop.f32.mrb[21].mxu0 }
 0x208   : > { %v2767_v63 = vsel %vm673_vm2, -1e+30, %v555_v62  ;;  %v557_v0 = vpop.f32.mrb[22].mxu0 }
 0x209   : > { %vm821_vm13 = vcmp.ge.f32.partialorder %v2763_v61, %v2767_v63  ;;  %v2773_v1 = vsel %vm672_vm1, -1e+30, %v557_v0  ;;  %v559_v3 = vpop.f32.mrb[23].mxu0 }
 0x20a   : > { %v822_v6 = vsel %vm821_vm13, %v2763_v61, %v2767_v63  ;;  %v2782_v10 = vsel %vm673_vm2, -1e+30, %v559_v3 }
 0x20b   : > { %824 = vmax.index.xlane.f32.xlu1 %v822_v6  ;;  %vm3578_vm14 = vcmp.ge.f32.partialorder %v2773_v1, %v2782_v10 }
 0x20c   : > { %v830_v11 = vsel %vm3578_vm14, %v2773_v1, %v2782_v10 }
 0x20e   : > { %v563_v14 = vpop.f32.mrb[24].mxu0 }
 0x20f   : > { %v2793_v16 = vsel %vm672_vm1, -1e+30, %v563_v14  ;;  %832 = vmax.index.xlane.f32.xlu1 %v830_v11  ;;  %v565_v18 = vpop.f32.mrb[25].mxu0 }
 0x210   : > { %v2797_v19 = vsel %vm673_vm2, -1e+30, %v565_v18  ;;  %v567_v20 = vpop.f32.mrb[26].mxu0 }
 0x211   : > { %vm837_vm15 = vcmp.ge.f32.partialorder %v2793_v16, %v2797_v19  ;;  %v2803_v22 = vsel %vm672_vm1, -1e+30, %v567_v20  ;;  %v569_v24 = vpop.f32.mrb[27].mxu0 }
 0x212   : > { %v838_v26 = vsel %vm837_vm15, %v2793_v16, %v2797_v19  ;;  %v2812_v28 = vsel %vm673_vm2, -1e+30, %v569_v24 }
 0x213   : > { %840 = vmax.index.xlane.f32.xlu1 %v838_v26  ;;  %vm3579_vm0 = vcmp.ge.f32.partialorder %v2803_v22, %v2812_v28 }
 0x214   : > { %v846_v29 = vsel %vm3579_vm0, %v2803_v22, %v2812_v28 }
 0x215   : > { %848 = vmax.index.xlane.f32.xlu0 %v846_v29 }
 0x216   : > { %v573_v30 = vpop.f32.mrb[28].mxu0 }
 0x217   : > { %v2823_v32 = vsel %vm672_vm1, -1e+30, %v573_v30  ;;  %v575_v34 = vpop.f32.mrb[29].mxu0 }
 0x218   : > { %v2827_v36 = vsel %vm673_vm2, -1e+30, %v575_v34  ;;  %v577_v38 = vpop.f32.mrb[30].mxu0 }
 0x219   : > { %vm3580_vm14 = vcmp.ge.f32.partialorder %v2823_v32, %v2827_v36  ;;  %v2833_v39 = vsel %vm672_vm1, -1e+30, %v577_v38  ;;  %v579_v40 = vpop.f32.mrb[31].mxu0 }
 0x21a   : > { %v854_v42 = vsel %vm3580_vm14, %v2823_v32, %v2827_v36  ;;  %v2842_v44 = vsel %vm673_vm2, -1e+30, %v579_v40 }
 0x21b   : > { %856 = vmax.index.xlane.f32.xlu0 %v854_v42  ;;  %vm3581_vm0 = vcmp.ge.f32.partialorder %v2833_v39, %v2842_v44 }
 0x21c   : > { %v862_v46 = vsel %vm3581_vm0, %v2833_v39, %v2842_v44 }
 0x21d   : > { %864 = vmax.index.xlane.f32.xlu1 %v862_v46 }
 0x21e   : > { %v583_v48 = vpop.f32.mrb[32].mxu0 }
 0x21f   : > { %v2853_v49 = vsel %vm672_vm1, -1e+30, %v583_v48  ;;  %v585_v50 = vpop.f32.mrb[33].mxu0 }
 0x220   : > { %v2857_v52 = vsel %vm673_vm2, -1e+30, %v585_v50  ;;  %v587_v54 = vpop.f32.mrb[34].mxu0 }
 0x221   : > { %vm3582_vm14 = vcmp.ge.f32.partialorder %v2853_v49, %v2857_v52  ;;  %v2863_v56 = vsel %vm672_vm1, -1e+30, %v587_v54  ;;  %v589_v58 = vpop.f32.mrb[35].mxu0 }
 0x222   : > { %v2867_v59 = vsel %vm673_vm2, -1e+30, %v589_v58  ;;  %v870_v60 = vsel %vm3582_vm14, %v2853_v49, %v2857_v52 }
 0x223   : > { %vm3583_vm0 = vcmp.ge.f32.partialorder %v2863_v56, %v2867_v59  ;;  %872 = vmax.index.xlane.f32.xlu0 %v870_v60 }
 0x224   : > { %v878_v62 = vsel %vm3583_vm0, %v2863_v56, %v2867_v59 }
 0x225   : > { %880 = vmax.index.xlane.f32.xlu1 %v878_v62 }
 0x226   : > { %v593_v0 = vpop.f32.mrb[36].mxu0 }
 0x227   : > { %v2883_v3 = vsel %vm672_vm1, -1e+30, %v593_v0  ;;  %v595_v6 = vpop.f32.mrb[37].mxu0 }
 0x228   : > { %v2887_v11 = vsel %vm673_vm2, -1e+30, %v595_v6  ;;  %v597_v14 = vpop.f32.mrb[38].mxu0 }
 0x229   : > { %vm3584_vm14 = vcmp.ge.f32.partialorder %v2883_v3, %v2887_v11  ;;  %v2893_v18 = vsel %vm672_vm1, -1e+30, %v597_v14  ;;  %v599_v20 = vpop.f32.mrb[39].mxu0 }
 0x22a   : > { %v2897_v24 = vsel %vm673_vm2, -1e+30, %v599_v20  ;;  %v886_v26 = vsel %vm3584_vm14, %v2883_v3, %v2887_v11 }
 0x22b   : > { %vm3585_vm0 = vcmp.ge.f32.partialorder %v2893_v18, %v2897_v24  ;;  %888 = vmax.index.xlane.f32.xlu1 %v886_v26 }
 0x22c   : > { %v894_v29 = vsel %vm3585_vm0, %v2893_v18, %v2897_v24 }
 0x22d   : > { %896 = vmax.index.xlane.f32.xlu0 %v894_v29 }
 0x22e   : > { %v603_v30 = vpop.f32.mrb[40].mxu0 }
 0x22f   : > { %v2913_v34 = vsel %vm672_vm1, -1e+30, %v603_v30  ;;  %v605_v38 = vpop.f32.mrb[41].mxu0 }
 0x230   : > { %v2917_v40 = vsel %vm673_vm2, -1e+30, %v605_v38  ;;  %v607_v42 = vpop.f32.mrb[42].mxu0 }
 0x231   : > { %vm3586_vm14 = vcmp.ge.f32.partialorder %v2913_v34, %v2917_v40  ;;  %v2923_v46 = vsel %vm672_vm1, -1e+30, %v607_v42  ;;  %v609_v48 = vpop.f32.mrb[43].mxu0 }
 0x232   : > { %v2927_v50 = vsel %vm673_vm2, -1e+30, %v609_v48  ;;  %v902_v54 = vsel %vm3586_vm14, %v2913_v34, %v2917_v40 }
 0x233   : > { %vm3587_vm0 = vcmp.ge.f32.partialorder %v2923_v46, %v2927_v50  ;;  %904 = vmax.index.xlane.f32.xlu1 %v902_v54 }
 0x234   : > { %v910_v58 = vsel %vm3587_vm0, %v2923_v46, %v2927_v50 }
 0x235   : > { %912 = vmax.index.xlane.f32.xlu0 %v910_v58 }
 0x236   : > { %v613_v60 = vpop.f32.mrb[44].mxu0 }
 0x237   : > { %v2943_v62 = vsel %vm672_vm1, -1e+30, %v613_v60  ;;  %v615_v0 = vpop.f32.mrb[45].mxu0 }
 0x238   : > { %v2947_v6 = vsel %vm673_vm2, -1e+30, %v615_v0  ;;  %v617_v14 = vpop.f32.mrb[46].mxu0 }
 0x239   : > { %vm3588_vm14 = vcmp.ge.f32.partialorder %v2943_v62, %v2947_v6  ;;  %v2953_v20 = vsel %vm672_vm1, -1e+30, %v617_v14  ;;  %v619_v26 = vpop.f32.mrb[47].mxu0 }
 0x23a   : > { %v2957_v29 = vsel %vm673_vm2, -1e+30, %v619_v26  ;;  %v918_v30 = vsel %vm3588_vm14, %v2943_v62, %v2947_v6 }
 0x23b   : > { %vm3589_vm0 = vcmp.ge.f32.partialorder %v2953_v20, %v2957_v29  ;;  %920 = vmax.index.xlane.f32.xlu0 %v918_v30 }
 0x23c   : > { %v926_v38 = vsel %vm3589_vm0, %v2953_v20, %v2957_v29 }
 0x23e   : > { %v623_v42 = vpop.f32.mrb[48].mxu0 }
 0x23f   : > { %v2973_v48 = vsel %vm672_vm1, -1e+30, %v623_v42  ;;  %928 = vmax.index.xlane.f32.xlu0 %v926_v38  ;;  %v625_v54 = vpop.f32.mrb[49].mxu0 }
 0x240   : > { %v2977_v58 = vsel %vm673_vm2, -1e+30, %v625_v54  ;;  %v627_v60 = vpop.f32.mrb[50].mxu0 }
 0x241   : > { %3627 = vst [vmem:[#allocation13_spill] sm:$0xff] %v2977_v58  ;;  %vm3591_vm14 = vcmp.ge.f32.partialorder %v2973_v48, %v2977_v58  ;;  %v2983_v0 = vsel %vm672_vm1, -1e+30, %v627_v60  ;;  %v629_v14 = vpop.f32.mrb[51].mxu0 }
 0x242   : > { %v2987_v26 = vsel %vm673_vm2, -1e+30, %v629_v14  ;;  %v934_v30 = vsel %vm3591_vm14, %v2973_v48, %v2977_v58 }
 0x243   : > { %vm3594_vm0 = vcmp.ge.f32.partialorder %v2983_v0, %v2987_v26  ;;  %936 = vmax.index.xlane.f32.xlu0 %v934_v30 }
 0x244   : > { %v942_v38 = vsel %vm3594_vm0, %v2983_v0, %v2987_v26 }
 0x246   : > { %v633_v42 = vpop.f32.mrb[52].mxu0 }
 0x247   : > { %v3003_v54 = vsel %vm672_vm1, -1e+30, %v633_v42  ;;  %944 = vmax.index.xlane.f32.xlu0 %v942_v38  ;;  %v635_v60 = vpop.f32.mrb[53].mxu0 }
 0x248   : > { %3628 = vst [vmem:[#allocation14_spill] sm:$0xff] %v3003_v54  ;;  %v3007_v14 = vsel %vm673_vm2, -1e+30, %v635_v60  ;;  %v637_v7 = vpop.f32.mrb[54].mxu0 }
 0x249   : > { %3629 = vst [vmem:[#allocation15_spill] sm:$0xff] %v3007_v14  ;;  %vm3598_vm14 = vcmp.ge.f32.partialorder %v3003_v54, %v3007_v14  ;;  %v3013_v30 = vsel %vm672_vm1, -1e+30, %v637_v7  ;;  %v639_v5 = vpop.f32.mrb[55].mxu0 }
 0x24a   : > { %3630 = vst [vmem:[#allocation16_spill] sm:$0xff] %v3013_v30  ;;  %v3017_v2 = vsel %vm673_vm2, -1e+30, %v639_v5  ;;  %v950_v38 = vsel %vm3598_vm14, %v3003_v54, %v3007_v14 }
 0x24b   : > { %3631 = vst [vmem:[#allocation17_spill] sm:$0xff] %v3017_v2  ;;  %vm3601_vm0 = vcmp.ge.f32.partialorder %v3013_v30, %v3017_v2  ;;  %952 = vmax.index.xlane.f32.xlu0 %v950_v38 }
 0x24c   : > { %v958_v7 = vsel %vm3601_vm0, %v3013_v30, %v3017_v2 }
 0x24e   : > { %v643_v42 = vpop.f32.mrb[56].mxu0 }
 0x24f   : > { %v3033_v5 = vsel %vm672_vm1, -1e+30, %v643_v42  ;;  %960 = vmax.index.xlane.f32.xlu0 %v958_v7  ;;  %v645_v60 = vpop.f32.mrb[57].mxu0 }
 0x250   : > { %3632 = vst [vmem:[#allocation18_spill] sm:$0xff] %v3033_v5  ;;  %v3037_v4 = vsel %vm673_vm2, -1e+30, %v645_v60  ;;  %v647_v14 = vpop.f32.mrb[58].mxu0 }
 0x251   : > { %3633 = vst [vmem:[#allocation19_spill] sm:$0xff] %v3037_v4  ;;  %vm3604_vm14 = vcmp.ge.f32.partialorder %v3033_v5, %v3037_v4  ;;  %v3043_v38 = vsel %vm672_vm1, -1e+30, %v647_v14  ;;  %v649_v2 = vpop.f32.mrb[59].mxu0 }
 0x252   : > { %3634 = vst [vmem:[#allocation20_spill] sm:$0xff] %v3043_v38  ;;  %v3047_v30 = vsel %vm673_vm2, -1e+30, %v649_v2  ;;  %v3054_v7 = vsel %vm3604_vm14, %v3033_v5, %v3037_v4 }
 0x253   : > { %3635 = vst [vmem:[#allocation21_spill] sm:$0xff] %v3047_v30  ;;  %vm3608_vm0 = vcmp.ge.f32.partialorder %v3043_v38, %v3047_v30 }
 0x254   : > { %v3063_v14 = vsel %vm3608_vm0, %v3043_v38, %v3047_v30 }
 0x256   : > { %v653_v42 = vpop.f32.mrb[60].mxu0 }
 0x257   : > { %v3067_v2 = vsel %vm672_vm1, -1e+30, %v653_v42  ;;  %v655_v60 = vpop.f32.mrb[61].mxu0 }
 0x258   : > { %3636 = vst [vmem:[#allocation22_spill] sm:$0xff] %v3067_v2  ;;  %v3071_v4 = vsel %vm673_vm2, -1e+30, %v655_v60  ;;  %v657_v5 = vpop.f32.mrb[62].mxu0 }
 0x259   : > { %3637 = vst [vmem:[#allocation23_spill] sm:$0xff] %v3071_v4  ;;  %vm981_vm14 = vcmp.ge.f32.partialorder %v3067_v2, %v3071_v4  ;;  %v3077_v54 = vsel %vm672_vm1, -1e+30, %v657_v5  ;;  %v659_v30 = vpop.f32.mrb[63].mxu0  ;;  %vm3639_vm1 = vcmp.ge.f32.partialorder %v2773_v1, %v2782_v10 }
 0x25a   : > { %v3081_v38 = vsel %vm673_vm2, -1e+30, %v659_v30  ;;  %v3088_v42 = vsel %vm981_vm14, %v3067_v2, %v3071_v4  ;;  %v3100_v30 = vand.u32 127, %v3638_v9  ;;  %vm3640_vm2 = vcmp.ge.f32.partialorder %v2823_v32, %v2827_v36 }
 0x25b   : > { %vm989_vm0 = vcmp.ge.f32.partialorder %v3077_v54, %v3081_v38 }
 0x25c   : > { %v3097_v8 = vsel %vm989_vm0, %v3077_v54, %v3081_v38  ;;  %v3103_v60 = vadd.s32 128, %v3100_v30 }
 0x25e   : > { %v743_v4 = vsel %vm741_vm3, %v3100_v30, %v3103_v60  ;;  %v751_v9 = vsel %vm749_vm4, %v3100_v30, %v3103_v60  ;;  %v783_v15 = vsel %vm781_vm8, %v3100_v30, %v3103_v60  ;;  %v775_v25 = vsel %vm773_vm7, %v3100_v30, %v3103_v60 }
 0x25f   : > { %v799_v23 = vsel %vm797_vm10, %v3100_v30, %v3103_v60  ;;  %v791_v35 = vsel %vm789_vm9, %v3100_v30, %v3103_v60  ;;  %v807_v37 = vsel %vm805_vm11, %v3100_v30, %v3103_v60  ;;  %v823_v45 = vsel %vm821_vm13, %v3100_v30, %v3103_v60 }
 0x260   : > { %v815_v51 = vsel %vm813_vm12, %v3100_v30, %v3103_v60  ;;  %v839_v53 = vsel %vm837_vm15, %v3100_v30, %v3103_v60  ;;  %v831_v63 = vsel %vm3639_vm1, %v3100_v30, %v3103_v60  ;;  %v855_v55 = vsel %vm3640_vm2, %v3100_v30, %v3103_v60 }
 0x261   : > { %vm3641_vm3 = vcmp.ge.f32.partialorder %v2803_v22, %v2812_v28  ;;  %vm3642_vm4 = vcmp.ge.f32.partialorder %v2863_v56, %v2867_v59  ;;  %vm3645_vm7 = vcmp.ge.f32.partialorder %v2883_v3, %v2887_v11  ;;  %vm3646_vm8 = vcmp.ge.f32.partialorder %v2893_v18, %v2897_v24 }
 0x262   : > { %v847_v19 = vsel %vm3641_vm3, %v3100_v30, %v3103_v60  ;;  %v879_v1 = vsel %vm3642_vm4, %v3100_v30, %v3103_v60  ;;  %vm3647_vm9 = vcmp.ge.f32.partialorder %v2923_v46, %v2927_v50  ;;  %vm3648_vm10 = vcmp.ge.f32.partialorder %v2983_v0, %v2987_v26 }
 0x263   : > { %v911_v18 = vsel %vm3647_vm9, %v3100_v30, %v3103_v60  ;;  %v2296_v50 = vmov 1.0|1.0   ;;  %vm3649_vm9 = vcmp.ge.f32.partialorder %v2913_v34, %v2917_v40 }
 0x270   : > { %v745_v5 = vpop.xlane.xlu1 %744 }
 0x271   : > { %2056 = vset.pattern.permute.xlu1 %v745_v5  ;;  %v767_v5 = vsel %vm765_vm6, %v3100_v30, %v3103_v60  ;;  %vm3644_vm6 = vcmp.ge.f32.partialorder %v2853_v49, %v2857_v52 }
 0x272   : > { %v871_v28 = vsel %vm3644_vm6, %v3100_v30, %v3103_v60 }
 0x274   : > { %v753_v2 = vpop.xlane.xlu1 %752 }
 0x275   : > { %747 = vperm.xlu1 %2056, %v743_v4  }
 0x278   : > { %v761_v12 = vpop.xlane.xlu0 %760 }
 0x279   : > { %2057 = vset.pattern.permute.xlu1 %v753_v2  ;;  %v943_v2 = vsel %vm3648_vm10, %v3100_v30, %v3103_v60 }
 0x27a   : > { %v769_v58 = vpop.xlane.xlu1 %768 }
 0x27b   : > { %2059 = vset.pattern.permute.xlu0 %v769_v58  ;;  %v759_v58 = vsel %vm757_vm5, %v3100_v30, %v3103_v60  ;;  %vm3643_vm5 = vcmp.ge.f32.partialorder %v2833_v39, %v2842_v44  ;;  %v887_v39 = vsel %vm3645_vm7, %v3100_v30, %v3103_v60  ;;  %v895_v44 = vsel %vm3646_vm8, %v3100_v30, %v3103_v60 }
 0x27c   : > { %v863_v32 = vsel %vm3643_vm5, %v3100_v30, %v3103_v60 }
 0x27d   : > { %755 = vperm.xlu1 %2057, %v751_v9  }
 0x27f   : > { %771 = vperm.xlu0 %2059, %v767_v5  }
 0x280   : > { %v777_v4 = vpop.xlane.xlu1 %776 }
 0x281   : > { %2058 = vset.pattern.permute.xlu1 %v761_v12  ;;  %v3652_v12 = vld [vmem:[#allocation13_spill] sm:$0xff] }
 0x284   : > { %v785_v13 = vpop.xlane.xlu1 %784 }
 0x285   : > { %763 = vperm.xlu1 %2058, %v759_v58   ;;  %2061 = vset.pattern.permute.xlu0 %v785_v13 }
 0x288   : > { %v793_v21 = vpop.xlane.xlu0 %792 }
 0x289   : > { %2060 = vset.pattern.permute.xlu1 %v777_v4  ;;  %787 = vperm.xlu0 %2061, %v783_v15  }
 0x28a   : > { %v801_v17 = vpop.xlane.xlu1 %800 }
 0x28d   : > { %779 = vperm.xlu1 %2060, %v775_v25   ;;  %2063 = vset.pattern.permute.xlu0 %v801_v17  ;;  %v3657_v17 = vld [vmem:[#allocation16_spill] sm:$0xff]  ;;  %v3658_v25 = vld [vmem:[#allocation17_spill] sm:$0xff] }
 0x290   : > { %v809_v27 = vpop.xlane.xlu1 %808 }
 0x291   : > { %2062 = vset.pattern.permute.xlu1 %v793_v21  ;;  %803 = vperm.xlu0 %2063, %v799_v23  }
 0x292   : > { %v817_v41 = vpop.xlane.xlu0 %816 }
 0x295   : > { %795 = vperm.xlu1 %2062, %v791_v35  }
 0x298   : > { %v825_v31 = vpop.xlane.xlu1 %824 }
 0x299   : > { %2064 = vset.pattern.permute.xlu1 %v809_v27  ;;  %2066 = vset.pattern.permute.xlu0 %v825_v31 }
 0x29c   : > { %v833_v33 = vpop.xlane.xlu1 %832 }
 0x29d   : > { %811 = vperm.xlu1 %2064, %v807_v37   ;;  %827 = vperm.xlu0 %2066, %v823_v45  }
 0x2a0   : > { %v841_v43 = vpop.xlane.xlu1 %840 }
 0x2a1   : > { %2065 = vset.pattern.permute.xlu1 %v817_v41  ;;  %2068 = vset.pattern.permute.xlu0 %v841_v43 }
 0x2a2   : > { %v849_v47 = vpop.xlane.xlu0 %848 }
 0x2a5   : > { %819 = vperm.xlu1 %2065, %v815_v51   ;;  %843 = vperm.xlu0 %2068, %v839_v53   ;;  %v3661_v51 = vld [vmem:[#allocation21_spill] sm:$0xff] }
 0x2a8   : > { %v857_v61 = vpop.xlane.xlu0 %856 }
 0x2a9   : > { %2067 = vset.pattern.permute.xlu1 %v833_v33  ;;  %2070 = vset.pattern.permute.xlu0 %v857_v61 }
 0x2aa   : > { %v865_v57 = vpop.xlane.xlu1 %864 }
 0x2ad   : > { %835 = vperm.xlu1 %2067, %v831_v63   ;;  %859 = vperm.xlu0 %2070, %v855_v55  }
 0x2b0   : > { %v873_v10 = vpop.xlane.xlu0 %872 }
 0x2b1   : > { %2069 = vset.pattern.permute.xlu1 %v849_v47  ;;  %v3660_v47 = vld [vmem:[#allocation20_spill] sm:$0xff] }
 0x2b2   : > { %v881_v16 = vpop.xlane.xlu1 %880 }
 0x2b3   : > { %2073 = vset.pattern.permute.xlu0 %v881_v16 }
 0x2b5   : > { %851 = vperm.xlu1 %2069, %v847_v19  }
 0x2b7   : > { %883 = vperm.xlu0 %2073, %v879_v1  }
 0x2b8   : > { %v889_v56 = vpop.xlane.xlu1 %888 }
 0x2b9   : > { %2071 = vset.pattern.permute.xlu1 %v865_v57  ;;  %v983_v57 = vsel %vm981_vm14, %v3100_v30, %v3103_v60 }
 0x2ba   : > { %v897_v36 = vpop.xlane.xlu0 %896 }
 0x2bd   : > { %867 = vperm.xlu1 %2071, %v863_v32   ;;  %v3665_v32 = vld [vmem:[#allocation18_spill] sm:$0xff] }
 0x2c0   : > { %v905_v49 = vpop.xlane.xlu1 %904 }
 0x2c1   : > { %2072 = vset.pattern.permute.xlu1 %v873_v10 }
 0x2c2   : > { %v913_v22 = vpop.xlane.xlu0 %912 }
 0x2c3   : > { %2077 = vset.pattern.permute.xlu0 %v913_v22 }
 0x2c5   : > { %875 = vperm.xlu1 %2072, %v871_v28   ;;  %v991_v28 = vsel %vm989_vm0, %v3100_v30, %v3103_v60 }
 0x2c8   : > { %v921_v52 = vpop.xlane.xlu0 %920 }
 0x2c9   : > { %2074 = vset.pattern.permute.xlu1 %v889_v56 }
 0x2cc   : > { %v929_v59 = vpop.xlane.xlu0 %928 }
 0x2cd   : > { %891 = vperm.xlu1 %2074, %v887_v39   ;;  %v1198_v39 = vld [vmem:[%s2526_s19 + $0x48] sm:$0xff] }
 0x2ce   : > { %1309 = vmatprep.mubr.f32.mxu1 %v1198_v39 }
 0x2d0   : > { %v3208_v3 = vpop.xlane.xlu0 %936 }
 0x2d1   : > { %2075 = vset.pattern.permute.xlu1 %v897_v36  ;;  %v3666_v36 = vld [vmem:[#allocation19_spill] sm:$0xff] }
 0x2d4   : > { %v945_v11 = vpop.xlane.xlu0 %944 }
 0x2d5   : > { %899 = vperm.xlu1 %2075, %v895_v44  }
 0x2d6   : > { %976 = vmax.index.xlane.f32.xlu0 %v3063_v14 }
 0x2d8   : > { %v3215_v24 = vpop.xlane.xlu0 %952 }
 0x2d9   : > { %2076 = vset.pattern.permute.xlu1 %v905_v49 }
 0x2da   : > { %984 = vmax.index.xlane.f32.xlu0 %v3088_v42 }
 0x2dc   : > { %v3226_v46 = vpop.xlane.xlu0 %960 }
 0x2de   : > { %992 = vmax.index.xlane.f32.xlu0 %v3097_v8 }
 0x2f4   : > { %915 = vperm.xlu0 %2077, %v911_v18   ;;  %v748_v14 = vpop.permute.xlu1 %747 }
 0x2f5   : > { %vm998_vm11 = vcmp.eq.s32.totalorder %v3103_v60, %v748_v14  ;;  %vm997_vm15 = vcmp.eq.s32.totalorder %v3100_v30, %v748_v14  ;;  %v1197_v14 = vld [vmem:[%s2526_s19 + $0x40] sm:$0xff] }
 0x2f8   : > { %2081 = vset.pattern.permute.xlu0 %v945_v11 }
 0x2f9   : > { %968 = vmax.index.xlane.f32.xlu1 %v3054_v7  ;;  %v903_v7 = vsel %vm3649_vm9, %v3100_v30, %v3103_v60  ;;  %vm3651_vm9 = vcmp.ge.f32.partialorder %v2953_v20, %v2957_v29  ;;  %v3654_v20 = vld [vmem:[#allocation14_spill] sm:$0xff]  ;;  %v3655_v29 = vld [vmem:[#allocation15_spill] sm:$0xff] }
 0x2fc   : > { %v756_v42 = vpop.permute.xlu1 %755  ;;  %947 = vperm.xlu0 %2081, %v943_v2   ;;  %v1189_v2 = vld [vmem:[%s2526_s19] sm:$0xff] }
 0x2fd   : > { %vm999_vm12 = vcmp.eq.s32.totalorder %v3100_v30, %v756_v42  ;;  %vm1000_vm13 = vcmp.eq.s32.totalorder %v3103_v60, %v756_v42  ;;  %v1199_v42 = vld [vmem:[%s2526_s19 + $0x50] sm:$0xff] }
 0x2fe   : > { %vm1762_vm1 = vmpackc.low %vm1000_vm13, %vm998_vm11  ;;  %v772_v0 = vpop.permute.xlu0 %771 }
 0x2ff   : > { %vm1764_vm2 = vmpackc.low %vm999_vm12, %vm997_vm15  ;;  %1763 = vmatprep.subr.msk.bf16.mxu0 %vm1762_vm1, %v2296_v50  ;;  %1826 = vmatprep.subr.msk.bf16.mxu1 %vm1762_vm1, %v2296_v50  ;;  %vm1004_vm3 = vcmp.eq.s32.totalorder %v3103_v60, %v772_v0  ;;  %vm1003_vm6 = vcmp.eq.s32.totalorder %v3100_v30, %v772_v0  ;;  %v1202_v0 = vld [vmem:[%s2526_s19 + $0x68] sm:$0xff] }
 0x300   : > { %1765 = vmatpush1.bf16.xpose.msk.msra.mxu0 %vm1764_vm2, %v2296_v50  ;;  %1842 = vmatpush1.bf16.xpose.msk.msra.mxu1 %vm1764_vm2, %v2296_v50  ;;  %vm3650_vm2 = vcmp.ge.f32.partialorder %v2943_v62, %v2947_v6  ;;  %v927_v62 = vsel %vm3651_vm9, %v3100_v30, %v3103_v60 }
 0x301   : > { %v919_v34 = vsel %vm3650_vm2, %v3100_v30, %v3103_v60 }
 0x304   : > { %v764_v26 = vpop.permute.xlu1 %763 }
 0x305   : > { %vm1001_vm4 = vcmp.eq.s32.totalorder %v3100_v30, %v764_v26  ;;  %vm1002_vm5 = vcmp.eq.s32.totalorder %v3103_v60, %v764_v26  ;;  %v1194_v26 = vld [vmem:[%s2526_s19 + $0x28] sm:$0xff] }
 0x306   : > { %vm1766_vm7 = vmpackc.low %vm1004_vm3, %vm1002_vm5 }
 0x307   : > { %vm1768_vm8 = vmpackc.low %vm1003_vm6, %vm1001_vm4  ;;  %1767 = vmatprep.subr.msk.bf16.mxu0 %vm1766_vm7, %v2296_v50  ;;  %1827 = vmatprep.subr.msk.bf16.mxu1 %vm1766_vm7, %v2296_v50 }
 0x308   : > { %1769 = vmatpush1.bf16.xpose.msk.msra.mxu0 %vm1768_vm8, %v2296_v50  ;;  %1843 = vmatpush1.bf16.xpose.msk.msra.mxu1 %vm1768_vm8, %v2296_v50  ;;  %v788_v8 = vpop.permute.xlu0 %787 }
 0x309   : > { %vm1008_vm10 = vcmp.eq.s32.totalorder %v3103_v60, %v788_v8  ;;  %vm1007_vm13 = vcmp.eq.s32.totalorder %v3100_v30, %v788_v8  ;;  %v1204_v8 = vld [vmem:[%s2526_s19 + $0x78] sm:$0xff] }
 0x30a   : > { %907 = vperm.xlu1 %2076, %v903_v7   ;;  %v1193_v7 = vld [vmem:[%s2526_s19 + $0x20] sm:$0xff] }
 0x30c   : > { %v780_v9 = vpop.permute.xlu1 %779 }
 0x30d   : > { %vm1005_vm11 = vcmp.eq.s32.totalorder %v3100_v30, %v780_v9  ;;  %vm1006_vm12 = vcmp.eq.s32.totalorder %v3103_v60, %v780_v9  ;;  %v1196_v9 = vld [vmem:[%s2526_s19 + $0x38] sm:$0xff] }
 0x30e   : > { %vm1770_vm15 = vmpackc.low %vm1008_vm10, %vm1006_vm12  ;;  %2078 = vset.pattern.permute.xlu1 %v921_v52  ;;  %vm3653_vm10 = vcmp.ge.f32.partialorder %v2973_v48, %v3652_v12  ;;  %v1207_v12 = vld [vmem:[%s2526_s19 + $0x90] sm:$0xff] }
 0x30f   : > { %vm1772_vm1 = vmpackc.low %vm1007_vm13, %vm1005_vm11  ;;  %1771 = vmatprep.subr.msk.bf16.mxu0 %vm1770_vm15, %v2296_v50  ;;  %1828 = vmatprep.subr.msk.bf16.mxu1 %vm1770_vm15, %v2296_v50  ;;  %v935_v4 = vsel %vm3653_vm10, %v3100_v30, %v3103_v60  ;;  %vm3659_vm10 = vcmp.ge.f32.partialorder %v3657_v17, %v3658_v25  ;;  %v1215_v17 = vld [vmem:[%s2526_s19 + $0xd0] sm:$0xff]  ;;  %v1218_v25 = vld [vmem:[%s2526_s19 + $0xe8] sm:$0xff] }
 0x310   : > { %1773 = vmatpush1.bf16.xpose.msk.msra.mxu0 %vm1772_vm1, %v2296_v50  ;;  %1844 = vmatpush1.bf16.xpose.msk.msra.mxu1 %vm1772_vm1, %v2296_v50  ;;  %v804_v40 = vpop.permute.xlu0 %803  ;;  %v959_v21 = vsel %vm3659_vm10, %v3100_v30, %v3103_v60 }
 0x311   : > { %vm1012_vm3 = vcmp.eq.s32.totalorder %v3103_v60, %v804_v40  ;;  %vm1011_vm6 = vcmp.eq.s32.totalorder %v3100_v30, %v804_v40  ;;  %v1195_v40 = vld [vmem:[%s2526_s19 + $0x30] sm:$0xff] }
 0x312   : > { %923 = vperm.xlu1 %2078, %v919_v34   ;;  %v1203_v34 = vld [vmem:[%s2526_s19 + $0x70] sm:$0xff] }
 0x314   : > { %v796_v5 = vpop.permute.xlu1 %795 }
 0x315   : > { %vm1009_vm4 = vcmp.eq.s32.totalorder %v3100_v30, %v796_v5  ;;  %vm1010_vm5 = vcmp.eq.s32.totalorder %v3103_v60, %v796_v5  ;;  %v1206_v5 = vld [vmem:[%s2526_s19 + $0x88] sm:$0xff] }
 0x316   : > { %vm1774_vm7 = vmpackc.low %vm1012_vm3, %vm1010_vm5  ;;  %2079 = vset.pattern.permute.xlu1 %v929_v59  ;;  %vm3656_vm3 = vcmp.ge.f32.partialorder %v3654_v20, %v3655_v29  ;;  %v1190_v59 = vld [vmem:[%s2526_s19 + $0x8] sm:$0xff]  ;;  %v1212_v20 = vld [vmem:[%s2526_s19 + $0xb8] sm:$0xff] }
 0x317   : > { %vm1776_vm8 = vmpackc.low %vm1011_vm6, %vm1009_vm4  ;;  %1775 = vmatprep.subr.msk.bf16.mxu0 %vm1774_vm7, %v2296_v50  ;;  %1829 = vmatprep.subr.msk.bf16.mxu1 %vm1774_vm7, %v2296_v50  ;;  %v951_v48 = vsel %vm3656_vm3, %v3100_v30, %v3103_v60  ;;  %v1211_v29 = vld [vmem:[%s2526_s19 + $0xb0] sm:$0xff] }
 0x318   : > { %1777 = vmatpush1.bf16.xpose.msk.msra.mxu0 %vm1776_vm8, %v2296_v50  ;;  %1845 = vmatpush1.bf16.xpose.msk.msra.mxu1 %vm1776_vm8, %v2296_v50 }
 0x319   : > { %1285 = vmatprep.mubr.f32.mxu0 %v1190_v59 }
 0x31a   : > { %931 = vperm.xlu1 %2079, %v927_v62   ;;  %v1205_v62 = vld [vmem:[%s2526_s19 + $0x80] sm:$0xff] }
 0x31c   : > { %v812_v6 = vpop.permute.xlu1 %811  ;;  %v828_v58 = vpop.permute.xlu0 %827 }
 0x31d   : > { %vm1014_vm11 = vcmp.eq.s32.totalorder %v3103_v60, %v812_v6  ;;  %vm1013_vm15 = vcmp.eq.s32.totalorder %v3100_v30, %v812_v6  ;;  %vm1018_vm4 = vcmp.eq.s32.totalorder %v3103_v60, %v828_v58  ;;  %vm1017_vm7 = vcmp.eq.s32.totalorder %v3100_v30, %v828_v58  ;;  %v1208_v6 = vld [vmem:[%s2526_s19 + $0x98] sm:$0xff]  ;;  %v1213_v58 = vld [vmem:[%s2526_s19 + $0xc0] sm:$0xff] }
 0x31e   : > { %2080 = vset.pattern.permute.xlu1 %v3208_v3 }
 0x322   : > { %939 = vperm.xlu1 %2080, %v935_v4   ;;  %v1210_v4 = vld [vmem:[%s2526_s19 + $0xa8] sm:$0xff] }
 0x324   : > { %v820_v13 = vpop.permute.xlu1 %819  ;;  %v844_v23 = vpop.permute.xlu0 %843 }
 0x325   : > { %vm1015_vm12 = vcmp.eq.s32.totalorder %v3100_v30, %v820_v13  ;;  %vm1016_vm13 = vcmp.eq.s32.totalorder %v3103_v60, %v820_v13  ;;  %v1209_v13 = vld [vmem:[%s2526_s19 + $0xa0] sm:$0xff] }
 0x326   : > { %vm1778_vm1 = vmpackc.low %vm1016_vm13, %vm1014_vm11  ;;  %2082 = vset.pattern.permute.xlu1 %v3215_v24  ;;  %vm1022_vm11 = vcmp.eq.s32.totalorder %v3103_v60, %v844_v23 }
 0x327   : > { %vm1780_vm2 = vmpackc.low %vm1015_vm12, %vm1013_vm15  ;;  %1779 = vmatprep.subr.msk.bf16.mxu0 %vm1778_vm1, %v2296_v50  ;;  %1830 = vmatprep.subr.msk.bf16.mxu1 %vm1778_vm1, %v2296_v50  ;;  %vm1021_vm15 = vcmp.eq.s32.totalorder %v3100_v30, %v844_v23  ;;  %v1220_v23 = vld [vmem:[%s2526_s19 + $0xf8] sm:$0xff] }
 0x328   : > { %1781 = vmatpush1.bf16.xpose.msk.msra.mxu0 %vm1780_vm2, %v2296_v50  ;;  %1846 = vmatpush1.bf16.xpose.msk.msra.mxu1 %vm1780_vm2, %v2296_v50 }
 0x32a   : > { %955 = vperm.xlu1 %2082, %v951_v48   ;;  %v1214_v48 = vld [vmem:[%s2526_s19 + $0xc8] sm:$0xff] }
 0x32c   : > { %v836_v15 = vpop.permute.xlu1 %835  ;;  %v860_v35 = vpop.permute.xlu0 %859 }
 0x32d   : > { %vm1019_vm5 = vcmp.eq.s32.totalorder %v3100_v30, %v836_v15  ;;  %vm1020_vm6 = vcmp.eq.s32.totalorder %v3103_v60, %v836_v15  ;;  %vm1026_vm3 = vcmp.eq.s32.totalorder %v3103_v60, %v860_v35  ;;  %v1216_v15 = vld [vmem:[%s2526_s19 + $0xd8] sm:$0xff] }
 0x32e   : > { %vm1782_vm8 = vmpackc.low %vm1020_vm6, %vm1018_vm4  ;;  %2083 = vset.pattern.permute.xlu1 %v3226_v46  ;;  %vm1025_vm6 = vcmp.eq.s32.totalorder %v3100_v30, %v860_v35  ;;  %v1191_v46 = vld [vmem:[%s2526_s19 + $0x10] sm:$0xff]  ;;  %v1383_v35 = vld [vmem:[#allocation2] sm:$0x3] }
 0x32f   : > { %vm1784_vm9 = vmpackc.low %vm1019_vm5, %vm1017_vm7  ;;  %1783 = vmatprep.subr.msk.bf16.mxu0 %vm1782_vm8, %v2296_v50  ;;  %1831 = vmatprep.subr.msk.bf16.mxu1 %vm1782_vm8, %v2296_v50 }
 0x330   : > { %1785 = vmatpush1.bf16.xpose.msk.msra.mxu0 %vm1784_vm9, %v2296_v50  ;;  %1847 = vmatpush1.bf16.xpose.msk.msra.mxu1 %vm1784_vm9, %v2296_v50 }
 0x332   : > { %963 = vperm.xlu1 %2083, %v959_v21   ;;  %v1217_v21 = vld [vmem:[%s2526_s19 + $0xe0] sm:$0xff] }
 0x334   : > { %v852_v27 = vpop.permute.xlu1 %851 }
 0x335   : > { %vm1023_vm12 = vcmp.eq.s32.totalorder %v3100_v30, %v852_v27  ;;  %vm1024_vm13 = vcmp.eq.s32.totalorder %v3103_v60, %v852_v27  ;;  %v1219_v27 = vld [vmem:[%s2526_s19 + $0xf0] sm:$0xff] }
 0x336   : > { %vm1786_vm1 = vmpackc.low %vm1024_vm13, %vm1022_vm11  ;;  %v884_v33 = vpop.permute.xlu0 %883 }
 0x337   : > { %vm1788_vm2 = vmpackc.low %vm1023_vm12, %vm1021_vm15  ;;  %1787 = vmatprep.subr.msk.bf16.mxu0 %vm1786_vm1, %v2296_v50  ;;  %1832 = vmatprep.subr.msk.bf16.mxu1 %vm1786_vm1, %v2296_v50  ;;  %vm1032_vm9 = vcmp.eq.s32.totalorder %v3103_v60, %v884_v33  ;;  %vm1031_vm12 = vcmp.eq.s32.totalorder %v3100_v30, %v884_v33 }
 0x338   : > { %1789 = vmatpush1.bf16.xpose.msk.msra.mxu0 %vm1788_vm2, %v2296_v50  ;;  %1848 = vmatpush1.bf16.xpose.msk.msra.mxu1 %vm1788_vm2, %v2296_v50 }
 0x33c   : > { %v868_v31 = vpop.permute.xlu1 %867 }
 0x33d   : > { %vm1027_vm4 = vcmp.eq.s32.totalorder %v3100_v30, %v868_v31  ;;  %vm1028_vm5 = vcmp.eq.s32.totalorder %v3103_v60, %v868_v31  ;;  %v3668_v31 = vld [vmem:[#allocation12_spill] sm:$0xff] }
 0x33e   : > { %vm1790_vm7 = vmpackc.low %vm1028_vm5, %vm1026_vm3  ;;  %v3669_v33 = vsub.s32 0, %v3668_v31 }
 0x33f   : > { %vm1792_vm8 = vmpackc.low %vm1027_vm4, %vm1025_vm6  ;;  %1791 = vmatprep.subr.msk.bf16.mxu0 %vm1790_vm7, %v2296_v50  ;;  %1833 = vmatprep.subr.msk.bf16.mxu1 %vm1790_vm7, %v2296_v50  ;;  %vm3662_vm7 = vcmp.ge.f32.partialorder %v3660_v47, %v3661_v51 }
 0x340   : > { %1793 = vmatpush1.bf16.xpose.msk.msra.mxu0 %vm1792_vm8, %v2296_v50  ;;  %1849 = vmatpush1.bf16.xpose.msk.msra.mxu1 %vm1792_vm8, %v2296_v50  ;;  %v975_v53 = vsel %vm3662_vm7, %v3100_v30, %v3103_v60  ;;  %vm3667_vm8 = vcmp.ge.f32.partialorder %v3665_v32, %v3666_v36 }
 0x341   : > { %v967_v22 = vsel %vm3667_vm8, %v3100_v30, %v3103_v60 }
 0x344   : > { %v876_v37 = vpop.permute.xlu1 %875 }
 0x345   : > { %vm1029_vm10 = vcmp.eq.s32.totalorder %v3100_v30, %v876_v37  ;;  %vm1030_vm11 = vcmp.eq.s32.totalorder %v3103_v60, %v876_v37  ;;  %v3440_v37 = vrot.slane %v1383_v35, %v3669_v33 }
 0x346   : > { %vm1794_vm13 = vmpackc.low %vm1032_vm9, %vm1030_vm11 }
 0x347   : > { %vm1796_vm15 = vmpackc.low %vm1031_vm12, %vm1029_vm10  ;;  %1795 = vmatprep.subr.msk.bf16.mxu0 %vm1794_vm13, %v2296_v50  ;;  %1834 = vmatprep.subr.msk.bf16.mxu1 %vm1794_vm13, %v2296_v50 }
 0x348   : > { %1797 = vmatpush1.bf16.xpose.msk.msra.mxu0 %vm1796_vm15, %v2296_v50  ;;  %1850 = vmatpush1.bf16.xpose.msk.msra.mxu1 %vm1796_vm15, %v2296_v50 }
 0x34c   : > { %v892_v45 = vpop.permute.xlu1 %891 }
 0x34d   : > { %vm1034_vm1 = vcmp.eq.s32.totalorder %v3103_v60, %v892_v45  ;;  %vm1033_vm4 = vcmp.eq.s32.totalorder %v3100_v30, %v892_v45  ;;  %v3670_v45 = vsub.s32 1, %v3668_v31 }
 0x354   : > { %v900_v41 = vpop.permute.xlu1 %899 }
 0x355   : > { %vm1035_vm2 = vcmp.eq.s32.totalorder %v3100_v30, %v900_v41  ;;  %vm1036_vm3 = vcmp.eq.s32.totalorder %v3103_v60, %v900_v41  ;;  %v3444_v41 = vrot.slane %v1383_v35, %v3670_v45 }
 0x356   : > { %vm1798_vm5 = vmpackc.low %vm1036_vm3, %vm1034_vm1 }
 0x357   : > { %vm1800_vm6 = vmpackc.low %vm1035_vm2, %vm1033_vm4  ;;  %1799 = vmatprep.subr.msk.bf16.mxu0 %vm1798_vm5, %v2296_v50  ;;  %1835 = vmatprep.subr.msk.bf16.mxu1 %vm1798_vm5, %v2296_v50 }
 0x358   : > { %1801 = vmatpush1.bf16.xpose.msk.msra.mxu0 %vm1800_vm6, %v2296_v50  ;;  %1851 = vmatpush1.bf16.xpose.msk.msra.mxu1 %vm1800_vm6, %v2296_v50 }
 0x363   : > { %v977_v43 = vpop.xlane.xlu0 %976 }
 0x364   : > { %2085 = vset.pattern.permute.xlu1 %v977_v43 }
 0x367   : > { %v985_v61 = vpop.xlane.xlu0 %984 }
 0x368   : > { %979 = vperm.xlu1 %2085, %v975_v53  }
 0x36b   : > { %v993_v16 = vpop.xlane.xlu0 %992 }
 0x36c   : > { %2086 = vset.pattern.permute.xlu1 %v985_v61 }
 0x370   : > { %987 = vperm.xlu1 %2086, %v983_v57  }
 0x373   : > { %v916_v1 = vpop.permute.xlu0 %915 }
 0x374   : > { %vm1040_vm9 = vcmp.eq.s32.totalorder %v3103_v60, %v916_v1  ;;  %vm1039_vm14 = vcmp.eq.s32.totalorder %v3100_v30, %v916_v1 }
 0x37b   : > { %v948_v54 = vpop.permute.xlu0 %947 }
 0x37c   : > { %vm1048_vm0 = vcmp.eq.s32.totalorder %v3103_v60, %v948_v54  ;;  %vm1047_vm8 = vcmp.eq.s32.totalorder %v3100_v30, %v948_v54 }
 0x386   : > { %v969_v19 = vpop.xlane.xlu1 %968 }
 0x387   : > { %2084 = vset.pattern.permute.xlu0 %v969_v19 }
 0x38a   : > { %v908_v10 = vpop.permute.xlu1 %907 }
 0x38b   : > { %vm1037_vm10 = vcmp.eq.s32.totalorder %v3100_v30, %v908_v10  ;;  %vm1038_vm11 = vcmp.eq.s32.totalorder %v3103_v60, %v908_v10  ;;  %971 = vperm.xlu0 %2084, %v967_v22  }
 0x38c   : > { %vm1802_vm12 = vmpackc.low %vm1040_vm9, %vm1038_vm11 }
 0x38d   : > { %vm1804_vm13 = vmpackc.low %vm1039_vm14, %vm1037_vm10  ;;  %1803 = vmatprep.subr.msk.bf16.mxu0 %vm1802_vm12, %v2296_v50  ;;  %1836 = vmatprep.subr.msk.bf16.mxu1 %vm1802_vm12, %v2296_v50 }
 0x38e   : > { %1805 = vmatpush1.bf16.xpose.msk.msra.mxu0 %vm1804_vm13, %v2296_v50  ;;  %1852 = vmatpush1.bf16.xpose.msk.msra.mxu1 %vm1804_vm13, %v2296_v50 }
 0x38f   : > { %2087 = vset.pattern.permute.xlu0 %v993_v16 }
 0x391   : > { %v924_v56 = vpop.permute.xlu1 %923 }
 0x392   : > { %vm1042_vm15 = vcmp.eq.s32.totalorder %v3103_v60, %v924_v56  ;;  %vm1041_vm3 = vcmp.eq.s32.totalorder %v3100_v30, %v924_v56 }
 0x393   : > { %995 = vperm.xlu0 %2087, %v991_v28  }
 0x399   : > { %v932_v44 = vpop.permute.xlu1 %931 }
 0x39a   : > { %vm1043_vm1 = vcmp.eq.s32.totalorder %v3100_v30, %v932_v44  ;;  %vm1044_vm2 = vcmp.eq.s32.totalorder %v3103_v60, %v932_v44 }
 0x39b   : > { %vm1806_vm4 = vmpackc.low %vm1044_vm2, %vm1042_vm15 }
 0x39c   : > { %vm1808_vm5 = vmpackc.low %vm1043_vm1, %vm1041_vm3  ;;  %1807 = vmatprep.subr.msk.bf16.mxu0 %vm1806_vm4, %v2296_v50  ;;  %1837 = vmatprep.subr.msk.bf16.mxu1 %vm1806_vm4, %v2296_v50 }
 0x39d   : > { %1809 = vmatpush1.bf16.xpose.msk.msra.mxu0 %vm1808_vm5, %v2296_v50  ;;  %1853 = vmatpush1.bf16.xpose.msk.msra.mxu1 %vm1808_vm5, %v2296_v50 }
 0x3a1   : > { %v940_v38 = vpop.permute.xlu1 %939 }
 0x3a2   : > { %vm1045_vm6 = vcmp.eq.s32.totalorder %v3100_v30, %v940_v38  ;;  %vm1046_vm7 = vcmp.eq.s32.totalorder %v3103_v60, %v940_v38 }
 0x3a3   : > { %vm1810_vm9 = vmpackc.low %vm1048_vm0, %vm1046_vm7 }
 0x3a4   : > { %vm1812_vm10 = vmpackc.low %vm1047_vm8, %vm1045_vm6  ;;  %1811 = vmatprep.subr.msk.bf16.mxu0 %vm1810_vm9, %v2296_v50  ;;  %1838 = vmatprep.subr.msk.bf16.mxu1 %vm1810_vm9, %v2296_v50 }
 0x3a5   : > { %1813 = vmatpush1.bf16.xpose.msk.msra.mxu0 %vm1812_vm10, %v2296_v50  ;;  %1854 = vmatpush1.bf16.xpose.msk.msra.mxu1 %vm1812_vm10, %v2296_v50 }
 0x3a9   : > { %v956_v49 = vpop.permute.xlu1 %955 }
 0x3aa   : > { %vm1050_vm11 = vcmp.eq.s32.totalorder %v3103_v60, %v956_v49  ;;  %vm1049_vm13 = vcmp.eq.s32.totalorder %v3100_v30, %v956_v49 }
 0x3b1   : > { %v964_v52 = vpop.permute.xlu1 %963 }
 0x3b2   : > { %vm1051_vm14 = vcmp.eq.s32.totalorder %v3100_v30, %v964_v52  ;;  %vm1052_vm12 = vcmp.eq.s32.totalorder %v3103_v60, %v964_v52 }
 0x3b3   : > { %vm1814_vm15 = vmpackc.low %vm1052_vm12, %vm1050_vm11 }
 0x3b4   : > { %vm1816_vm1 = vmpackc.low %vm1051_vm14, %vm1049_vm13  ;;  %1815 = vmatprep.subr.msk.bf16.mxu0 %vm1814_vm15, %v2296_v50  ;;  %1839 = vmatprep.subr.msk.bf16.mxu1 %vm1814_vm15, %v2296_v50 }
 0x3b5   : > { %1817 = vmatpush1.bf16.xpose.msk.msra.mxu0 %vm1816_vm1, %v2296_v50  ;;  %1855 = vmatpush1.bf16.xpose.msk.msra.mxu1 %vm1816_vm1, %v2296_v50 }
 0x3e7   : > { %v980_v3 = vpop.permute.xlu1 %979 }
 0x3e8   : > { %vm1056_vm2 = vcmp.eq.s32.totalorder %v3103_v60, %v980_v3  ;;  %vm1055_vm5 = vcmp.eq.s32.totalorder %v3100_v30, %v980_v3 }
 0x3ef   : > { %v988_v18 = vpop.permute.xlu1 %987 }
 0x3f0   : > { %vm1058_vm7 = vcmp.eq.s32.totalorder %v3103_v60, %v988_v18  ;;  %vm1057_vm10 = vcmp.eq.s32.totalorder %v3100_v30, %v988_v18 }
 0x40a   : > { %v972_v11 = vpop.permute.xlu0 %971 }
 0x40b   : > { %vm1053_vm3 = vcmp.eq.s32.totalorder %v3100_v30, %v972_v11  ;;  %vm1054_vm4 = vcmp.eq.s32.totalorder %v3103_v60, %v972_v11 }
 0x40c   : > { %vm1818_vm0 = vmpackc.low %vm1056_vm2, %vm1054_vm4 }
 0x40d   : > { %vm1820_vm6 = vmpackc.low %vm1055_vm5, %vm1053_vm3  ;;  %1819 = vmatprep.subr.msk.bf16.mxu0 %vm1818_vm0, %v2296_v50  ;;  %1840 = vmatprep.subr.msk.bf16.mxu1 %vm1818_vm0, %v2296_v50 }
 0x40e   : > { %1821 = vmatpush1.bf16.xpose.msk.msra.mxu0 %vm1820_vm6, %v2296_v50  ;;  %1856 = vmatpush1.bf16.xpose.msk.msra.mxu1 %vm1820_vm6, %v2296_v50 }
 0x412   : > { %v996_v24 = vpop.permute.xlu0 %995 }
 0x413   : > { %vm1059_vm8 = vcmp.eq.s32.totalorder %v3100_v30, %v996_v24  ;;  %vm1060_vm9 = vcmp.eq.s32.totalorder %v3103_v60, %v996_v24  ;;  %v1200_v60 = vld [vmem:[%s2526_s19 + $0x58] sm:$0xff] }
 0x414   : > { %vm1822_vm11 = vmpackc.low %vm1060_vm9, %vm1058_vm7  ;;  %v1192_v30 = vld [vmem:[%s2526_s19 + $0x18] sm:$0xff] }
 0x415   : > { %vm1824_vm14 = vmpackc.low %vm1059_vm8, %vm1057_vm10  ;;  %1823 = vmatprep.subr.msk.bf16.mxu0 %vm1822_vm11, %v2296_v50  ;;  %1841 = vmatprep.subr.msk.bf16.mxu1 %vm1822_vm11, %v2296_v50 }
 0x416   : > { %1825 = vmatpush1.bf16.xpose.msk.msra.mxu0 %vm1824_vm14, %v2296_v50  ;;  %1857 = vmatpush1.bf16.xpose.msk.msra.mxu1 %vm1824_vm14, %v2296_v50  ;;  %v1201_v50 = vld [vmem:[%s2526_s19 + $0x60] sm:$0xff] }
 0x41d   : > { %1310 = vmatmul.mubr.f32.vlgmr.msra.gmra.mrb[0].mxu1 %v1197_v14  ;;  %1286 = vmatmul.mubr.f32.vlgmr.msra.gmra.mrb[64].mxu0 %v1189_v2 }
 0x41e   : > { %1315 = vmatprep.mubr.f32.mxu1 %v1200_v60  ;;  %1291 = vmatprep.mubr.f32.mxu0 %v1192_v30 }
 0x421   : > { %1316 = vmatmul.mubr.f32.gmra.mrb[2].mxu1 %v1199_v42  ;;  %1292 = vmatmul.mubr.f32.gmra.mrb[66].mxu0 %v1191_v46 }
 0x422   : > { %1321 = vmatprep.mubr.f32.mxu1 %v1202_v0  ;;  %1297 = vmatprep.mubr.f32.mxu0 %v1194_v26 }
 0x425   : > { %1322 = vmatmul.mubr.f32.gmra.mrb[4].mxu1 %v1201_v50  ;;  %1298 = vmatmul.mubr.f32.gmra.mrb[68].mxu0 %v1193_v7 }
 0x426   : > { %1327 = vmatprep.mubr.f32.mxu1 %v1204_v8  ;;  %1303 = vmatprep.mubr.f32.mxu0 %v1196_v9 }
 0x429   : > { %1328 = vmatmul.mubr.f32.gmra.mrb[6].mxu1 %v1203_v34  ;;  %1304 = vmatmul.mubr.f32.gmra.mrb[70].mxu0 %v1195_v40 }
 0x42a   : > { %1333 = vmatprep.mubr.f32.mxu1 %v1206_v5 }
 0x42d   : > { %1334 = vmatmul.mubr.f32.gmra.mrb[8].mxu1 %v1205_v62 }
 0x42e   : > { %1339 = vmatprep.mubr.f32.mxu1 %v1208_v6 }
 0x431   : > { %1340 = vmatmul.mubr.f32.gmra.mrb[10].mxu1 %v1207_v12 }
 0x432   : > { %1345 = vmatprep.mubr.f32.mxu1 %v1210_v4 }
 0x435   : > { %1346 = vmatmul.mubr.f32.gmra.mrb[12].mxu1 %v1209_v13 }
 0x436   : > { %1351 = vmatprep.mubr.f32.mxu1 %v1212_v20 }
 0x439   : > { %1352 = vmatmul.mubr.f32.gmra.mrb[14].mxu1 %v1211_v29 }
 0x43a   : > { %1357 = vmatprep.mubr.f32.mxu1 %v1214_v48 }
 0x43d   : > { %1358 = vmatmul.mubr.f32.gmra.mrb[16].mxu1 %v1213_v58 }
 0x43e   : > { %1363 = vmatprep.mubr.f32.mxu1 %v1216_v15 }
 0x441   : > { %1364 = vmatmul.mubr.f32.gmra.mrb[18].mxu1 %v1215_v17 }
 0x442   : > { %1369 = vmatprep.mubr.f32.mxu1 %v1218_v25 }
 0x445   : > { %1370 = vmatmul.mubr.f32.gmra.mrb[20].mxu1 %v1217_v21 }
 0x446   : > { %1375 = vmatprep.mubr.f32.mxu1 %v1220_v23 }
 0x449   : > { %1376 = vmatmul.mubr.f32.gmra.mrb[22].mxu1 %v1219_v27 }
 0x4f0   : > { %v1311_v43 = vpop.f32.mrb[0].mxu1  ;;  %v1287_v47 = vpop.f32.mrb[64].mxu0 }
 0x4f1   : > { %v1403_v51 = vmul.f32 %v3440_v37, %v1311_v43  ;;  %v1313_v53 = vpop.f32.mrb[1].mxu1  ;;  %v1395_v61 = vmul.f32 %v3440_v37, %v1287_v47  ;;  %v1289_v63 = vpop.f32.mrb[65].mxu0 }
 0x4f2   : > { %v1404_v55 = vmul.f32 %v3444_v41, %v1313_v53  ;;  %v1396_v57 = vmul.f32 %v3444_v41, %v1289_v63 }
 0x4f3   : > { %1435 = vst [vmem:[%s3452_s7 + $0x40] sm:$0xff] %v1403_v51  ;;  %1427 = vst [vmem:[%s3452_s7] sm:$0xff] %v1395_v61 }
 0x4f4   : > { %1436 = vst [vmem:[%s3452_s7 + $0x48] sm:$0xff] %v1404_v55  ;;  %v1317_v16 = vpop.f32.mrb[2].mxu1  ;;  %1428 = vst [vmem:[%s3452_s7 + $0x8] sm:$0xff] %v1396_v57  ;;  %v1293_v19 = vpop.f32.mrb[66].mxu0 }
 0x4f5   : > { %v1405_v1 = vmul.f32 %v3440_v37, %v1317_v16  ;;  %v1319_v10 = vpop.f32.mrb[3].mxu1  ;;  %v1397_v32 = vmul.f32 %v3440_v37, %v1293_v19  ;;  %v1295_v36 = vpop.f32.mrb[67].mxu0 }
 0x4f6   : > { %v1406_v22 = vmul.f32 %v3444_v41, %v1319_v10  ;;  %v1398_v28 = vmul.f32 %v3444_v41, %v1295_v36 }
 0x4f7   : > { %1437 = vst [vmem:[%s3452_s7 + $0x50] sm:$0xff] %v1405_v1  ;;  %1429 = vst [vmem:[%s3452_s7 + $0x10] sm:$0xff] %v1397_v32 }
 0x4f8   : > { %1438 = vst [vmem:[%s3452_s7 + $0x58] sm:$0xff] %v1406_v22  ;;  %v1323_v56 = vpop.f32.mrb[4].mxu1  ;;  %1430 = vst [vmem:[%s3452_s7 + $0x18] sm:$0xff] %v1398_v28  ;;  %v1299_v39 = vpop.f32.mrb[68].mxu0 }
 0x4f9   : > { %v1407_v44 = vmul.f32 %v3440_v37, %v1323_v56  ;;  %v1325_v54 = vpop.f32.mrb[5].mxu1  ;;  %v1399_v38 = vmul.f32 %v3440_v37, %v1299_v39  ;;  %v1301_v49 = vpop.f32.mrb[69].mxu0 }
 0x4fa   : > { %v1408_v52 = vmul.f32 %v3444_v41, %v1325_v54  ;;  %v1400_v59 = vmul.f32 %v3444_v41, %v1301_v49 }
 0x4fb   : > { %1439 = vst [vmem:[%s3452_s7 + $0x60] sm:$0xff] %v1407_v44  ;;  %1431 = vst [vmem:[%s3452_s7 + $0x20] sm:$0xff] %v1399_v38 }
 0x4fc   : > { %1440 = vst [vmem:[%s3452_s7 + $0x68] sm:$0xff] %v1408_v52  ;;  %v1329_v3 = vpop.f32.mrb[6].mxu1  ;;  %1432 = vst [vmem:[%s3452_s7 + $0x28] sm:$0xff] %v1400_v59  ;;  %v1305_v11 = vpop.f32.mrb[70].mxu0 }
 0x4fd   : > { %v1409_v18 = vmul.f32 %v3440_v37, %v1329_v3  ;;  %v1331_v24 = vpop.f32.mrb[7].mxu1  ;;  %v1401_v14 = vmul.f32 %v3440_v37, %v1305_v11  ;;  %v1307_v2 = vpop.f32.mrb[71].mxu0 }
 0x4fe   : > { %v1410_v60 = vmul.f32 %v3444_v41, %v1331_v24  ;;  %v1402_v30 = vmul.f32 %v3444_v41, %v1307_v2 }
 0x4ff   : > { %1441 = vst [vmem:[%s3452_s7 + $0x70] sm:$0xff] %v1409_v18  ;;  %1433 = vst [vmem:[%s3452_s7 + $0x30] sm:$0xff] %v1401_v14 }
 0x500   : > { %1442 = vst [vmem:[%s3452_s7 + $0x78] sm:$0xff] %v1410_v60  ;;  %v1335_v42 = vpop.f32.mrb[8].mxu1  ;;  %1434 = vst [vmem:[%s3452_s7 + $0x38] sm:$0xff] %v1402_v30 }
 0x501   : > { %v1411_v46 = vmul.f32 %v3440_v37, %v1335_v42  ;;  %v1337_v0 = vpop.f32.mrb[9].mxu1 }
 0x502   : > { %v1412_v26 = vmul.f32 %v3444_v41, %v1337_v0 }
 0x503   : > { %1443 = vst [vmem:[%s3452_s7 + $0x80] sm:$0xff] %v1411_v46 }
 0x504   : > { %1444 = vst [vmem:[%s3452_s7 + $0x88] sm:$0xff] %v1412_v26  ;;  %v1341_v50 = vpop.f32.mrb[10].mxu1 }
 0x505   : > { %v1413_v7 = vmul.f32 %v3440_v37, %v1341_v50  ;;  %v1343_v8 = vpop.f32.mrb[11].mxu1 }
 0x506   : > { %v1414_v9 = vmul.f32 %v3444_v41, %v1343_v8 }
 0x507   : > { %1445 = vst [vmem:[%s3452_s7 + $0x90] sm:$0xff] %v1413_v7 }
 0x508   : > { %1446 = vst [vmem:[%s3452_s7 + $0x98] sm:$0xff] %v1414_v9  ;;  %v1347_v34 = vpop.f32.mrb[12].mxu1 }
 0x509   : > { %v1415_v40 = vmul.f32 %v3440_v37, %v1347_v34  ;;  %v1349_v5 = vpop.f32.mrb[13].mxu1 }
 0x50a   : > { %v1416_v62 = vmul.f32 %v3444_v41, %v1349_v5 }
 0x50b   : > { %1447 = vst [vmem:[%s3452_s7 + $0xa0] sm:$0xff] %v1415_v40 }
 0x50c   : > { %1448 = vst [vmem:[%s3452_s7 + $0xa8] sm:$0xff] %v1416_v62  ;;  %v1353_v6 = vpop.f32.mrb[14].mxu1 }
 0x50d   : > { %v1417_v12 = vmul.f32 %v3440_v37, %v1353_v6  ;;  %v1355_v4 = vpop.f32.mrb[15].mxu1 }
 0x50e   : > { %v1418_v13 = vmul.f32 %v3444_v41, %v1355_v4 }
 0x50f   : > { %1449 = vst [vmem:[%s3452_s7 + $0xb0] sm:$0xff] %v1417_v12 }
 0x510   : > { %1450 = vst [vmem:[%s3452_s7 + $0xb8] sm:$0xff] %v1418_v13  ;;  %v1359_v20 = vpop.f32.mrb[16].mxu1 }
 0x511   : > { %v1419_v29 = vmul.f32 %v3440_v37, %v1359_v20  ;;  %v1361_v48 = vpop.f32.mrb[17].mxu1 }
 0x512   : > { %v1420_v58 = vmul.f32 %v3444_v41, %v1361_v48 }
 0x513   : > { %1451 = vst [vmem:[%s3452_s7 + $0xc0] sm:$0xff] %v1419_v29 }
 0x514   : > { %1452 = vst [vmem:[%s3452_s7 + $0xc8] sm:$0xff] %v1420_v58  ;;  %v1365_v15 = vpop.f32.mrb[18].mxu1 }
 0x515   : > { %v1421_v17 = vmul.f32 %v3440_v37, %v1365_v15  ;;  %v1367_v25 = vpop.f32.mrb[19].mxu1 }
 0x516   : > { %v1422_v21 = vmul.f32 %v3444_v41, %v1367_v25 }
 0x517   : > { %1453 = vst [vmem:[%s3452_s7 + $0xd0] sm:$0xff] %v1421_v17 }
 0x518   : > { %1454 = vst [vmem:[%s3452_s7 + $0xd8] sm:$0xff] %v1422_v21  ;;  %v1371_v23 = vpop.f32.mrb[20].mxu1 }
 0x519   : > { %v1423_v27 = vmul.f32 %v3440_v37, %v1371_v23  ;;  %v1373_v35 = vpop.f32.mrb[21].mxu1 }
 0x51a   : > { %v1424_v31 = vmul.f32 %v3444_v41, %v1373_v35 }
 0x51b   : > { %1455 = vst [vmem:[%s3452_s7 + $0xe0] sm:$0xff] %v1423_v27 }
 0x51c   : > { %1456 = vst [vmem:[%s3452_s7 + $0xe8] sm:$0xff] %v1424_v31  ;;  %v1377_v33 = vpop.f32.mrb[22].mxu1 }
 0x51d   : > { %v1425_v45 = vmul.f32 %v3440_v37, %v1377_v33  ;;  %v1379_v43 = vpop.f32.mrb[23].mxu1 }
 0x51e   : > { %v1426_v47 = vmul.f32 %v3444_v41, %v1379_v43 }
 0x51f   : > { %1457 = vst [vmem:[%s3452_s7 + $0xf0] sm:$0xff] %v1425_v45 }
 0x520   : > { %1458 = vst [vmem:[%s3452_s7 + $0xf8] sm:$0xff] %v1426_v47 }
 0x521   : > { %2213 = shalt.err (!%p2210_p6)
}
 0x522   : > { %s2214_s1 = scalar_lea.hbm %s3516_s11, 4096  ;;  %s2218_s22 = scalar_lea.hbm %s3573_s3, 8192 }
 0x523   : > { %p2215_p12 = scmp.ne.s32.totalorder %s3516_s11, %s2214_s1  ;;  %p2219_p5 = scmp.lt.u32.totalorder %s3516_s11, %s3573_s3 }
 0x524   : > { %p2220_p11 = scmp.lt.u32.totalorder %s2218_s22, %s2214_s1  ;;  %p2222_p8 = scmp.lt.u32.totalorder %s2214_s1, %s3516_s11 }
 0x525   : > { %p2216_p10 = pnand %p2215_p12, %p3671_p13 }
 0x526   : > { %p2221_p0 = por %p2220_p11, %p2219_p5 }
 0x527   : > { %p2217_p9 = pneg %p2216_p10 }
 0x528   : > { %p2223_p4 = por %p2222_p8, %p2221_p0 }
 0x52a   : > { %p2224_p7 = pnand %p2223_p4, %p2217_p9 }
 0x52c   : > { %2227 = shalt.err (!%p2224_p7)
}
 0x52d   : > { %s2298_s10 = smov 256   ;;  %s2299_s19 = smov 16  }
 0x52e   : > { %1866 = dma.vmem_to_hbm [thread:$0]  (%p3671_p13), %s3518_s25, 4096, %s3516_s11, %s1460_s15, %s2298_s10, %s2298_s10, %s2299_s19  }
 0x52f PF: > { %s1490_s7 = sand.u32 1, %s2266_s12   ;;  %p3672_p1 = scmp.ne.s32.totalorder %s3618_s4, 0 }
 0x530   : > { %p3673_p3 = scmp.ge.s32.totalorder %s2286_s17, 2  ;;  %s1491_s9 = scalar_lea.sflag [#allocation4], %s1490_s7 }
 0x532   : > { %p1880_p2 = pnand %p3673_p3, %p3672_p1 }
 0x534   : > { %2261 = dma.done.wait (!%p1880_p2), %s1491_s9, 4096  }
 0x535   : > { %2263 = vsyncadd (!%p1880_p2), %s1491_s9, 4294963200  ;;  %s20_s17 = sadd.s32 1, %s2286_s17   ;;  %s3674_s12 = smov %s2270_s13 }
 0x536   : > { %p17_p6 = scmp.ge.s32.totalorder %s20_s17, 4   ;;  %s3675_s13 = smov %s2274_s14 }
 0x537   : > { %s3676_s14 = smov %s2368_s24  ;;  %s3677_s15 = smov %s2282_s16 }
 0x538   : > { %s3678_s16 = smov %s3680_s18  ;;  %19 = sbr.rel (!%p17_p6) target bundleno = 10 (0xa), region = 95 }
 0x53f   :  { %1496 = vsyncpa [#allocation3], 1 }
 0x540   :  { %1498 = vsyncpa [#allocation3 + $0x1], 1 }
 0x541   :  { %1499 = vsyncpa [#allocation6], 1 }
 0x542   :  { %1501 = vsyncpa [#allocation6 + $0x1], 1 }
 0x543   :  { %1502 = vsyncpa [#allocation4], 1 }
 0x544   :  { %1504 = vsyncpa [#allocation4 + $0x1], 1 }

</bundles_post_ra>
